<compile_context>
chip_gen: v7x
topology: tpu7x:2x2x1
jax: 0.10.0
libtpu: 0.0.40
codegen_flags: <defaults>
</compile_context>

<pallas_src>
import numpy as np
import jax
import jax.numpy as jnp
from jax import lax
from jax.experimental import pallas as pl
from jax.experimental.pallas import tpu as pltpu


def conv_block_forward(x_nchw, w_hwio, bias, *, pool=(2, 2)):
    """ConvBlock forward: Conv2d(KHxKW, padding='same') + bias -> ReLU -> MaxPool2d(pool)."""
    N, Cin, H, W = x_nchw.shape
    KH, KW, _, Cout = w_hwio.shape
    ph, pw = pool
    assert KH % 2 == 1 and KW % 2 == 1, "'same' padding assumes odd kernel"
    assert H % ph == 0 and W % pw == 0, "pool must divide spatial dims"
    pad_h, pad_w = KH // 2, KW // 2
    Ho, Wo = H // ph, W // pw

    # ---- plain-JAX glue: O(input) traffic, all in bf16 ---------------------
    x_nhwc = jnp.transpose(x_nchw.astype(jnp.bfloat16), (0, 2, 3, 1))
    Hp, Wp = H + 2 * pad_h, W + 2 * pad_w
    Hp_r = -(-Hp // ph) * ph                # round padded extent up to pool multiple
    Wp_r = -(-Wp // pw) * pw
    x_pad = jnp.pad(x_nhwc, ((0, 0),
                             (pad_h, Hp_r - H - pad_h),
                             (pad_w, Wp_r - W - pad_w),
                             (0, 0)))
    Hp2, Wp2 = Hp_r // ph, Wp_r // pw
    # space-to-depth over the pool window:
    #   x_ph[n, a*pw + b, u, v, :] == x_pad[n, ph*u + a, pw*v + b, :]
    x_ph = (x_pad.reshape(N, Hp2, ph, Wp2, pw, Cin)
                 .transpose(0, 2, 4, 1, 3, 5)
                 .reshape(N, ph * pw, Hp2, Wp2, Cin))

    # every in-kernel tap slice must fit inside the phase planes
    assert (ph - 1 + KH - 1) // ph + Ho <= Hp2
    assert (pw - 1 + KW - 1) // pw + Wo <= Wp2

    w2 = w_hwio.reshape(KH * KW, Cin, Cout).astype(jnp.bfloat16)
    b2 = bias.reshape(1, Cout).astype(jnp.float32)

    def kernel(x_ref, w_ref, b_ref, o_ref):
        # x_ref: (1, ph*pw, Hp2, Wp2, Cin) bf16  phase-split padded image
        # w_ref: (KH*KW, Cin, Cout)        bf16  conv weights (HWIO flattened)
        # b_ref: (1, Cout)                 f32   conv bias
        # o_ref: (1, Ho*Wo, Cout)          bf16  pooled output (unpadded Cout)
        m = None
        for r in range(ph):                          # pool phase along H
            for c in range(pw):                      # pool phase along W
                acc = None
                for kh in range(KH):                 # conv taps
                    a, u0 = (r + kh) % ph, (r + kh) // ph
                    for kw in range(KW):
                        b_, v0 = (c + kw) % pw, (c + kw) // pw
                        tap = x_ref[0, a * pw + b_, u0:u0 + Ho, v0:v0 + Wo, :]
                        d = jnp.dot(tap.reshape(Ho * Wo, Cin),
                                    w_ref[kh * KW + kw],
                                    preferred_element_type=jnp.float32)
                        acc = d if acc is None else acc + d
                m = acc if m is None else jnp.maximum(m, acc)     # max-pool
        # bias + ReLU in f32, single bf16 store (ReLU/bias commute with the max)
        o_ref[0] = jnp.maximum(m + b_ref[...], 0.0).astype(o_ref.dtype)

    out = pl.pallas_call(
        kernel,
        out_shape=jax.ShapeDtypeStruct((N, Ho * Wo, Cout), jnp.bfloat16),
        grid_spec=pltpu.PrefetchScalarGridSpec(
            num_scalar_prefetch=0,
            grid=(N,),                                   # even >=2 steps for v7x's 2 TCs
            in_specs=[
                pl.BlockSpec((1, ph * pw, Hp2, Wp2, Cin), lambda n: (n, 0, 0, 0, 0)),
                pl.BlockSpec((KH * KW, Cin, Cout), lambda n: (0, 0, 0)),
                pl.BlockSpec((1, Cout), lambda n: (0, 0)),
            ],
            out_specs=pl.BlockSpec((1, Ho * Wo, Cout), lambda n: (n, 0, 0)),
        ),
        compiler_params=pltpu.CompilerParams(dimension_semantics=("parallel",)),
        cost_estimate=pl.CostEstimate(
            flops=2 * N * H * W * KH * KW * Cin * Cout,
            transcendentals=0,
            bytes_accessed=int(x_ph.size) * 2 + int(w2.size) * 2
                           + int(b2.size) * 4 + N * Ho * Wo * Cout * 2,
        ),
    )(x_ph, w2, b2)

    # TODO(synk): for production ConvBlock sizes (Cin/Cout 64-512, large H/W) add a
    # Cout tile axis, a pooled-row tile axis (halo via pl.Element) and a K grid
    # axis with an f32 VMEM accumulator; at these shapes one image per grid step
    # is already far below VMEM on every TPU generation.
    out = out.astype(x_nchw.dtype).reshape(N, Ho, Wo, Cout)
    return jnp.transpose(out, (0, 3, 1, 2))              # back to NCHW (module interface)


if __name__ == "__main__":
    N, Cin, Cout, H, W = 2, 4, 8, 16, 16
    KH, KW = 3, 3

    key = jax.random.PRNGKey(0)
    kx, kw = jax.random.split(key)

    # Deterministic params mirroring the PyTorch module:
    # xavier_uniform_ on the conv weight, zeros on the bias.
    fan_in, fan_out = Cin * KH * KW, Cout * KH * KW
    bound = float(np.sqrt(6.0 / (fan_in + fan_out)))
    w = jax.random.uniform(kw, (KH, KW, Cin, Cout), jnp.float32, -bound, bound)  # HWIO
    b = jnp.zeros((Cout,), jnp.float32)
    x = jax.random.normal(kx, (N, Cin, H, W), dtype=jnp.float32)

    fwd = jax.jit(conv_block_forward)
    out = jax.block_until_ready(fwd(x, w, b))
    assert out.shape == (N, Cout, H // 2, W // 2)

    # Pure-JAX reference (XLA conv + relu + reduce_window max-pool).
    ref = lax.conv_general_dilated(x, w, (1, 1), "SAME",
                                   dimension_numbers=("NCHW", "HWIO", "NCHW"))
    ref = jnp.maximum(ref + b.reshape(1, Cout, 1, 1), 0.0)
    ref = lax.reduce_window(ref, -jnp.inf, lax.max, (1, 1, 2, 2), (1, 1, 2, 2), "VALID")
    np.testing.assert_allclose(np.asarray(out), np.asarray(ref), rtol=2e-2, atol=2e-2)

    print("KERNEL_OK")
</pallas_src>

<mosaic_0001>
module attributes {stable_mosaic.version = 11 : i64} {
  func.func @kernel(%arg0: i32, %arg1: memref<1x4x9x9x4xbf16, #tpu.memory_space<vmem>>, %arg2: memref<9x4x8xbf16, #tpu.memory_space<vmem>>, %arg3: memref<1x8xf32, #tpu.memory_space<vmem>>, %arg4: memref<1x64x8xbf16, #tpu.memory_space<vmem>>) attributes {dimension_semantics = [#tpu.dimension_semantics<parallel>], iteration_bounds = array<i64: 2>, scalar_prefetch = 0 : i64, scratch_operands = 0 : i64, tpu.core_type = #tpu.core_type<tc>, window_params = [{transform_indices = @transform_0, window_bounds = array<i64: 1, 4, 9, 9, 4>}, {pipeline_mode = #tpu.pipeline_mode<synchronous>, transform_indices = @transform_1, window_bounds = array<i64: 9, 4, 8>}, {pipeline_mode = #tpu.pipeline_mode<synchronous>, transform_indices = @transform_2, window_bounds = array<i64: 1, 8>}, {transform_indices = @transform_3, window_bounds = array<i64: 1, 64, 8>}]} {
    %c0 = arith.constant 0 : index
    %c0_0 = arith.constant 0 : index
    %c0_1 = arith.constant 0 : index
    %c0_2 = arith.constant 0 : index
    %c0_3 = arith.constant 0 : index
    %0 = vector.load %arg1[%c0, %c0_0, %c0_1, %c0_2, %c0_3] : memref<1x4x9x9x4xbf16, #tpu.memory_space<vmem>>, vector<1x1x8x8x4xbf16>
    %1 = vector.shape_cast %0 : vector<1x1x8x8x4xbf16> to vector<8x8x4xbf16>
    %2 = vector.shape_cast %1 : vector<8x8x4xbf16> to vector<64x4xbf16>
    %c0_4 = arith.constant 0 : index
    %c0_5 = arith.constant 0 : index
    %c0_6 = arith.constant 0 : index
    %3 = vector.load %arg2[%c0_4, %c0_5, %c0_6] : memref<9x4x8xbf16, #tpu.memory_space<vmem>>, vector<1x4x8xbf16>
    %4 = vector.shape_cast %3 : vector<1x4x8xbf16> to vector<4x8xbf16>
    %cst = arith.constant dense<0.000000e+00> : vector<64x8xf32>
    %5 = tpu.matmul %2, %4, %cst {dimension_numbers = #tpu.dot_dimension_numbers<[1], [0], [0], [1], [0, 0, 1, 1], [], []>} : vector<64x4xbf16>, vector<4x8xbf16>, vector<64x8xf32> -> vector<64x8xf32>
    %c0_7 = arith.constant 0 : index
    %c1 = arith.constant 1 : index
    %c0_8 = arith.constant 0 : index
    %c0_9 = arith.constant 0 : index
    %c0_10 = arith.constant 0 : index
    %6 = vector.load %arg1[%c0_7, %c1, %c0_8, %c0_9, %c0_10] : memref<1x4x9x9x4xbf16, #tpu.memory_space<vmem>>, vector<1x1x8x8x4xbf16>
    %7 = vector.shape_cast %6 : vector<1x1x8x8x4xbf16> to vector<8x8x4xbf16>
    %8 = vector.shape_cast %7 : vector<8x8x4xbf16> to vector<64x4xbf16>
    %c1_11 = arith.constant 1 : index
    %c0_12 = arith.constant 0 : index
    %c0_13 = arith.constant 0 : index
    %9 = vector.load %arg2[%c1_11, %c0_12, %c0_13] : memref<9x4x8xbf16, #tpu.memory_space<vmem>>, vector<1x4x8xbf16>
    %10 = vector.shape_cast %9 : vector<1x4x8xbf16> to vector<4x8xbf16>
    %cst_14 = arith.constant dense<0.000000e+00> : vector<64x8xf32>
    %11 = tpu.matmul %8, %10, %cst_14 {dimension_numbers = #tpu.dot_dimension_numbers<[1], [0], [0], [1], [0, 0, 1, 1], [], []>} : vector<64x4xbf16>, vector<4x8xbf16>, vector<64x8xf32> -> vector<64x8xf32>
    %12 = arith.addf %5, %11 : vector<64x8xf32>
    %c0_15 = arith.constant 0 : index
    %c0_16 = arith.constant 0 : index
    %c0_17 = arith.constant 0 : index
    %c1_18 = arith.constant 1 : index
    %c0_19 = arith.constant 0 : index
    %13 = vector.load %arg1[%c0_15, %c0_16, %c0_17, %c1_18, %c0_19] : memref<1x4x9x9x4xbf16, #tpu.memory_space<vmem>>, vector<1x1x8x8x4xbf16>
    %14 = vector.shape_cast %13 : vector<1x1x8x8x4xbf16> to vector<8x8x4xbf16>
    %15 = vector.shape_cast %14 : vector<8x8x4xbf16> to vector<64x4xbf16>
    %c2 = arith.constant 2 : index
    %c0_20 = arith.constant 0 : index
    %c0_21 = arith.constant 0 : index
    %16 = vector.load %arg2[%c2, %c0_20, %c0_21] : memref<9x4x8xbf16, #tpu.memory_space<vmem>>, vector<1x4x8xbf16>
    %17 = vector.shape_cast %16 : vector<1x4x8xbf16> to vector<4x8xbf16>
    %cst_22 = arith.constant dense<0.000000e+00> : vector<64x8xf32>
    %18 = tpu.matmul %15, %17, %cst_22 {dimension_numbers = #tpu.dot_dimension_numbers<[1], [0], [0], [1], [0, 0, 1, 1], [], []>} : vector<64x4xbf16>, vector<4x8xbf16>, vector<64x8xf32> -> vector<64x8xf32>
    %19 = arith.addf %12, %18 : vector<64x8xf32>
    %c0_23 = arith.constant 0 : index
    %c2_24 = arith.constant 2 : index
    %c0_25 = arith.constant 0 : index
    %c0_26 = arith.constant 0 : index
    %c0_27 = arith.constant 0 : index
    %20 = vector.load %arg1[%c0_23, %c2_24, %c0_25, %c0_26, %c0_27] : memref<1x4x9x9x4xbf16, #tpu.memory_space<vmem>>, vector<1x1x8x8x4xbf16>
    %21 = vector.shape_cast %20 : vector<1x1x8x8x4xbf16> to vector<8x8x4xbf16>
    %22 = vector.shape_cast %21 : vector<8x8x4xbf16> to vector<64x4xbf16>
    %c3 = arith.constant 3 : index
    %c0_28 = arith.constant 0 : index
    %c0_29 = arith.constant 0 : index
    %23 = vector.load %arg2[%c3, %c0_28, %c0_29] : memref<9x4x8xbf16, #tpu.memory_space<vmem>>, vector<1x4x8xbf16>
    %24 = vector.shape_cast %23 : vector<1x4x8xbf16> to vector<4x8xbf16>
    %cst_30 = arith.constant dense<0.000000e+00> : vector<64x8xf32>
    %25 = tpu.matmul %22, %24, %cst_30 {dimension_numbers = #tpu.dot_dimension_numbers<[1], [0], [0], [1], [0, 0, 1, 1], [], []>} : vector<64x4xbf16>, vector<4x8xbf16>, vector<64x8xf32> -> vector<64x8xf32>
    %26 = arith.addf %19, %25 : vector<64x8xf32>
    %c0_31 = arith.constant 0 : index
    %c3_32 = arith.constant 3 : index
    %c0_33 = arith.constant 0 : index
    %c0_34 = arith.constant 0 : index
    %c0_35 = arith.constant 0 : index
    %27 = vector.load %arg1[%c0_31, %c3_32, %c0_33, %c0_34, %c0_35] : memref<1x4x9x9x4xbf16, #tpu.memory_space<vmem>>, vector<1x1x8x8x4xbf16>
    %28 = vector.shape_cast %27 : vector<1x1x8x8x4xbf16> to vector<8x8x4xbf16>
    %29 = vector.shape_cast %28 : vector<8x8x4xbf16> to vector<64x4xbf16>
    %c4 = arith.constant 4 : index
    %c0_36 = arith.constant 0 : index
    %c0_37 = arith.constant 0 : index
    %30 = vector.load %arg2[%c4, %c0_36, %c0_37] : memref<9x4x8xbf16, #tpu.memory_space<vmem>>, vector<1x4x8xbf16>
    %31 = vector.shape_cast %30 : vector<1x4x8xbf16> to vector<4x8xbf16>
    %cst_38 = arith.constant dense<0.000000e+00> : vector<64x8xf32>
    %32 = tpu.matmul %29, %31, %cst_38 {dimension_numbers = #tpu.dot_dimension_numbers<[1], [0], [0], [1], [0, 0, 1, 1], [], []>} : vector<64x4xbf16>, vector<4x8xbf16>, vector<64x8xf32> -> vector<64x8xf32>
    %33 = arith.addf %26, %32 : vector<64x8xf32>
    %c0_39 = arith.constant 0 : index
    %c2_40 = arith.constant 2 : index
    %c0_41 = arith.constant 0 : index
    %c1_42 = arith.constant 1 : index
    %c0_43 = arith.constant 0 : index
    %34 = vector.load %arg1[%c0_39, %c2_40, %c0_41, %c1_42, %c0_43] : memref<1x4x9x9x4xbf16, #tpu.memory_space<vmem>>, vector<1x1x8x8x4xbf16>
    %35 = vector.shape_cast %34 : vector<1x1x8x8x4xbf16> to vector<8x8x4xbf16>
    %36 = vector.shape_cast %35 : vector<8x8x4xbf16> to vector<64x4xbf16>
    %c5 = arith.constant 5 : index
    %c0_44 = arith.constant 0 : index
    %c0_45 = arith.constant 0 : index
    %37 = vector.load %arg2[%c5, %c0_44, %c0_45] : memref<9x4x8xbf16, #tpu.memory_space<vmem>>, vector<1x4x8xbf16>
    %38 = vector.shape_cast %37 : vector<1x4x8xbf16> to vector<4x8xbf16>
    %cst_46 = arith.constant dense<0.000000e+00> : vector<64x8xf32>
    %39 = tpu.matmul %36, %38, %cst_46 {dimension_numbers = #tpu.dot_dimension_numbers<[1], [0], [0], [1], [0, 0, 1, 1], [], []>} : vector<64x4xbf16>, vector<4x8xbf16>, vector<64x8xf32> -> vector<64x8xf32>
    %40 = arith.addf %33, %39 : vector<64x8xf32>
    %c0_47 = arith.constant 0 : index
    %c0_48 = arith.constant 0 : index
    %c1_49 = arith.constant 1 : index
    %c0_50 = arith.constant 0 : index
    %c0_51 = arith.constant 0 : index
    %41 = vector.load %arg1[%c0_47, %c0_48, %c1_49, %c0_50, %c0_51] : memref<1x4x9x9x4xbf16, #tpu.memory_space<vmem>>, vector<1x1x8x8x4xbf16>
    %42 = vector.shape_cast %41 : vector<1x1x8x8x4xbf16> to vector<8x8x4xbf16>
    %43 = vector.shape_cast %42 : vector<8x8x4xbf16> to vector<64x4xbf16>
    %c6 = arith.constant 6 : index
    %c0_52 = arith.constant 0 : index
    %c0_53 = arith.constant 0 : index
    %44 = vector.load %arg2[%c6, %c0_52, %c0_53] : memref<9x4x8xbf16, #tpu.memory_space<vmem>>, vector<1x4x8xbf16>
    %45 = vector.shape_cast %44 : vector<1x4x8xbf16> to vector<4x8xbf16>
    %cst_54 = arith.constant dense<0.000000e+00> : vector<64x8xf32>
    %46 = tpu.matmul %43, %45, %cst_54 {dimension_numbers = #tpu.dot_dimension_numbers<[1], [0], [0], [1], [0, 0, 1, 1], [], []>} : vector<64x4xbf16>, vector<4x8xbf16>, vector<64x8xf32> -> vector<64x8xf32>
    %47 = arith.addf %40, %46 : vector<64x8xf32>
    %c0_55 = arith.constant 0 : index
    %c1_56 = arith.constant 1 : index
    %c1_57 = arith.constant 1 : index
    %c0_58 = arith.constant 0 : index
    %c0_59 = arith.constant 0 : index
    %48 = vector.load %arg1[%c0_55, %c1_56, %c1_57, %c0_58, %c0_59] : memref<1x4x9x9x4xbf16, #tpu.memory_space<vmem>>, vector<1x1x8x8x4xbf16>
    %49 = vector.shape_cast %48 : vector<1x1x8x8x4xbf16> to vector<8x8x4xbf16>
    %50 = vector.shape_cast %49 : vector<8x8x4xbf16> to vector<64x4xbf16>
    %c7 = arith.constant 7 : index
    %c0_60 = arith.constant 0 : index
    %c0_61 = arith.constant 0 : index
    %51 = vector.load %arg2[%c7, %c0_60, %c0_61] : memref<9x4x8xbf16, #tpu.memory_space<vmem>>, vector<1x4x8xbf16>
    %52 = vector.shape_cast %51 : vector<1x4x8xbf16> to vector<4x8xbf16>
    %cst_62 = arith.constant dense<0.000000e+00> : vector<64x8xf32>
    %53 = tpu.matmul %50, %52, %cst_62 {dimension_numbers = #tpu.dot_dimension_numbers<[1], [0], [0], [1], [0, 0, 1, 1], [], []>} : vector<64x4xbf16>, vector<4x8xbf16>, vector<64x8xf32> -> vector<64x8xf32>
    %54 = arith.addf %47, %53 : vector<64x8xf32>
    %c0_63 = arith.constant 0 : index
    %c0_64 = arith.constant 0 : index
    %c1_65 = arith.constant 1 : index
    %c1_66 = arith.constant 1 : index
    %c0_67 = arith.constant 0 : index
    %55 = vector.load %arg1[%c0_63, %c0_64, %c1_65, %c1_66, %c0_67] : memref<1x4x9x9x4xbf16, #tpu.memory_space<vmem>>, vector<1x1x8x8x4xbf16>
    %56 = vector.shape_cast %55 : vector<1x1x8x8x4xbf16> to vector<8x8x4xbf16>
    %57 = vector.shape_cast %56 : vector<8x8x4xbf16> to vector<64x4xbf16>
    %c8 = arith.constant 8 : index
    %c0_68 = arith.constant 0 : index
    %c0_69 = arith.constant 0 : index
    %58 = vector.load %arg2[%c8, %c0_68, %c0_69] : memref<9x4x8xbf16, #tpu.memory_space<vmem>>, vector<1x4x8xbf16>
    %59 = vector.shape_cast %58 : vector<1x4x8xbf16> to vector<4x8xbf16>
    %cst_70 = arith.constant dense<0.000000e+00> : vector<64x8xf32>
    %60 = tpu.matmul %57, %59, %cst_70 {dimension_numbers = #tpu.dot_dimension_numbers<[1], [0], [0], [1], [0, 0, 1, 1], [], []>} : vector<64x4xbf16>, vector<4x8xbf16>, vector<64x8xf32> -> vector<64x8xf32>
    %61 = arith.addf %54, %60 : vector<64x8xf32>
    %c0_71 = arith.constant 0 : index
    %c1_72 = arith.constant 1 : index
    %c0_73 = arith.constant 0 : index
    %c0_74 = arith.constant 0 : index
    %c0_75 = arith.constant 0 : index
    %62 = vector.load %arg1[%c0_71, %c1_72, %c0_73, %c0_74, %c0_75] : memref<1x4x9x9x4xbf16, #tpu.memory_space<vmem>>, vector<1x1x8x8x4xbf16>
    %63 = vector.shape_cast %62 : vector<1x1x8x8x4xbf16> to vector<8x8x4xbf16>
    %64 = vector.shape_cast %63 : vector<8x8x4xbf16> to vector<64x4xbf16>
    %c0_76 = arith.constant 0 : index
    %c0_77 = arith.constant 0 : index
    %c0_78 = arith.constant 0 : index
    %65 = vector.load %arg2[%c0_76, %c0_77, %c0_78] : memref<9x4x8xbf16, #tpu.memory_space<vmem>>, vector<1x4x8xbf16>
    %66 = vector.shape_cast %65 : vector<1x4x8xbf16> to vector<4x8xbf16>
    %cst_79 = arith.constant dense<0.000000e+00> : vector<64x8xf32>
    %67 = tpu.matmul %64, %66, %cst_79 {dimension_numbers = #tpu.dot_dimension_numbers<[1], [0], [0], [1], [0, 0, 1, 1], [], []>} : vector<64x4xbf16>, vector<4x8xbf16>, vector<64x8xf32> -> vector<64x8xf32>
    %c0_80 = arith.constant 0 : index
    %c0_81 = arith.constant 0 : index
    %c0_82 = arith.constant 0 : index
    %c1_83 = arith.constant 1 : index
    %c0_84 = arith.constant 0 : index
    %68 = vector.load %arg1[%c0_80, %c0_81, %c0_82, %c1_83, %c0_84] : memref<1x4x9x9x4xbf16, #tpu.memory_space<vmem>>, vector<1x1x8x8x4xbf16>
    %69 = vector.shape_cast %68 : vector<1x1x8x8x4xbf16> to vector<8x8x4xbf16>
    %70 = vector.shape_cast %69 : vector<8x8x4xbf16> to vector<64x4xbf16>
    %c1_85 = arith.constant 1 : index
    %c0_86 = arith.constant 0 : index
    %c0_87 = arith.constant 0 : index
    %71 = vector.load %arg2[%c1_85, %c0_86, %c0_87] : memref<9x4x8xbf16, #tpu.memory_space<vmem>>, vector<1x4x8xbf16>
    %72 = vector.shape_cast %71 : vector<1x4x8xbf16> to vector<4x8xbf16>
    %cst_88 = arith.constant dense<0.000000e+00> : vector<64x8xf32>
    %73 = tpu.matmul %70, %72, %cst_88 {dimension_numbers = #tpu.dot_dimension_numbers<[1], [0], [0], [1], [0, 0, 1, 1], [], []>} : vector<64x4xbf16>, vector<4x8xbf16>, vector<64x8xf32> -> vector<64x8xf32>
    %74 = arith.addf %67, %73 : vector<64x8xf32>
    %c0_89 = arith.constant 0 : index
    %c1_90 = arith.constant 1 : index
    %c0_91 = arith.constant 0 : index
    %c1_92 = arith.constant 1 : index
    %c0_93 = arith.constant 0 : index
    %75 = vector.load %arg1[%c0_89, %c1_90, %c0_91, %c1_92, %c0_93] : memref<1x4x9x9x4xbf16, #tpu.memory_space<vmem>>, vector<1x1x8x8x4xbf16>
    %76 = vector.shape_cast %75 : vector<1x1x8x8x4xbf16> to vector<8x8x4xbf16>
    %77 = vector.shape_cast %76 : vector<8x8x4xbf16> to vector<64x4xbf16>
    %c2_94 = arith.constant 2 : index
    %c0_95 = arith.constant 0 : index
    %c0_96 = arith.constant 0 : index
    %78 = vector.load %arg2[%c2_94, %c0_95, %c0_96] : memref<9x4x8xbf16, #tpu.memory_space<vmem>>, vector<1x4x8xbf16>
    %79 = vector.shape_cast %78 : vector<1x4x8xbf16> to vector<4x8xbf16>
    %cst_97 = arith.constant dense<0.000000e+00> : vector<64x8xf32>
    %80 = tpu.matmul %77, %79, %cst_97 {dimension_numbers = #tpu.dot_dimension_numbers<[1], [0], [0], [1], [0, 0, 1, 1], [], []>} : vector<64x4xbf16>, vector<4x8xbf16>, vector<64x8xf32> -> vector<64x8xf32>
    %81 = arith.addf %74, %80 : vector<64x8xf32>
    %c0_98 = arith.constant 0 : index
    %c3_99 = arith.constant 3 : index
    %c0_100 = arith.constant 0 : index
    %c0_101 = arith.constant 0 : index
    %c0_102 = arith.constant 0 : index
    %82 = vector.load %arg1[%c0_98, %c3_99, %c0_100, %c0_101, %c0_102] : memref<1x4x9x9x4xbf16, #tpu.memory_space<vmem>>, vector<1x1x8x8x4xbf16>
    %83 = vector.shape_cast %82 : vector<1x1x8x8x4xbf16> to vector<8x8x4xbf16>
    %84 = vector.shape_cast %83 : vector<8x8x4xbf16> to vector<64x4xbf16>
    %c3_103 = arith.constant 3 : index
    %c0_104 = arith.constant 0 : index
    %c0_105 = arith.constant 0 : index
    %85 = vector.load %arg2[%c3_103, %c0_104, %c0_105] : memref<9x4x8xbf16, #tpu.memory_space<vmem>>, vector<1x4x8xbf16>
    %86 = vector.shape_cast %85 : vector<1x4x8xbf16> to vector<4x8xbf16>
    %cst_106 = arith.constant dense<0.000000e+00> : vector<64x8xf32>
    %87 = tpu.matmul %84, %86, %cst_106 {dimension_numbers = #tpu.dot_dimension_numbers<[1], [0], [0], [1], [0, 0, 1, 1], [], []>} : vector<64x4xbf16>, vector<4x8xbf16>, vector<64x8xf32> -> vector<64x8xf32>
    %88 = arith.addf %81, %87 : vector<64x8xf32>
    %c0_107 = arith.constant 0 : index
    %c2_108 = arith.constant 2 : index
    %c0_109 = arith.constant 0 : index
    %c1_110 = arith.constant 1 : index
    %c0_111 = arith.constant 0 : index
    %89 = vector.load %arg1[%c0_107, %c2_108, %c0_109, %c1_110, %c0_111] : memref<1x4x9x9x4xbf16, #tpu.memory_space<vmem>>, vector<1x1x8x8x4xbf16>
    %90 = vector.shape_cast %89 : vector<1x1x8x8x4xbf16> to vector<8x8x4xbf16>
    %91 = vector.shape_cast %90 : vector<8x8x4xbf16> to vector<64x4xbf16>
    %c4_112 = arith.constant 4 : index
    %c0_113 = arith.constant 0 : index
    %c0_114 = arith.constant 0 : index
    %92 = vector.load %arg2[%c4_112, %c0_113, %c0_114] : memref<9x4x8xbf16, #tpu.memory_space<vmem>>, vector<1x4x8xbf16>
    %93 = vector.shape_cast %92 : vector<1x4x8xbf16> to vector<4x8xbf16>
    %cst_115 = arith.constant dense<0.000000e+00> : vector<64x8xf32>
    %94 = tpu.matmul %91, %93, %cst_115 {dimension_numbers = #tpu.dot_dimension_numbers<[1], [0], [0], [1], [0, 0, 1, 1], [], []>} : vector<64x4xbf16>, vector<4x8xbf16>, vector<64x8xf32> -> vector<64x8xf32>
    %95 = arith.addf %88, %94 : vector<64x8xf32>
    %c0_116 = arith.constant 0 : index
    %c3_117 = arith.constant 3 : index
    %c0_118 = arith.constant 0 : index
    %c1_119 = arith.constant 1 : index
    %c0_120 = arith.constant 0 : index
    %96 = vector.load %arg1[%c0_116, %c3_117, %c0_118, %c1_119, %c0_120] : memref<1x4x9x9x4xbf16, #tpu.memory_space<vmem>>, vector<1x1x8x8x4xbf16>
    %97 = vector.shape_cast %96 : vector<1x1x8x8x4xbf16> to vector<8x8x4xbf16>
    %98 = vector.shape_cast %97 : vector<8x8x4xbf16> to vector<64x4xbf16>
    %c5_121 = arith.constant 5 : index
    %c0_122 = arith.constant 0 : index
    %c0_123 = arith.constant 0 : index
    %99 = vector.load %arg2[%c5_121, %c0_122, %c0_123] : memref<9x4x8xbf16, #tpu.memory_space<vmem>>, vector<1x4x8xbf16>
    %100 = vector.shape_cast %99 : vector<1x4x8xbf16> to vector<4x8xbf16>
    %cst_124 = arith.constant dense<0.000000e+00> : vector<64x8xf32>
    %101 = tpu.matmul %98, %100, %cst_124 {dimension_numbers = #tpu.dot_dimension_numbers<[1], [0], [0], [1], [0, 0, 1, 1], [], []>} : vector<64x4xbf16>, vector<4x8xbf16>, vector<64x8xf32> -> vector<64x8xf32>
    %102 = arith.addf %95, %101 : vector<64x8xf32>
    %c0_125 = arith.constant 0 : index
    %c1_126 = arith.constant 1 : index
    %c1_127 = arith.constant 1 : index
    %c0_128 = arith.constant 0 : index
    %c0_129 = arith.constant 0 : index
    %103 = vector.load %arg1[%c0_125, %c1_126, %c1_127, %c0_128, %c0_129] : memref<1x4x9x9x4xbf16, #tpu.memory_space<vmem>>, vector<1x1x8x8x4xbf16>
    %104 = vector.shape_cast %103 : vector<1x1x8x8x4xbf16> to vector<8x8x4xbf16>
    %105 = vector.shape_cast %104 : vector<8x8x4xbf16> to vector<64x4xbf16>
    %c6_130 = arith.constant 6 : index
    %c0_131 = arith.constant 0 : index
    %c0_132 = arith.constant 0 : index
    %106 = vector.load %arg2[%c6_130, %c0_131, %c0_132] : memref<9x4x8xbf16, #tpu.memory_space<vmem>>, vector<1x4x8xbf16>
    %107 = vector.shape_cast %106 : vector<1x4x8xbf16> to vector<4x8xbf16>
    %cst_133 = arith.constant dense<0.000000e+00> : vector<64x8xf32>
    %108 = tpu.matmul %105, %107, %cst_133 {dimension_numbers = #tpu.dot_dimension_numbers<[1], [0], [0], [1], [0, 0, 1, 1], [], []>} : vector<64x4xbf16>, vector<4x8xbf16>, vector<64x8xf32> -> vector<64x8xf32>
    %109 = arith.addf %102, %108 : vector<64x8xf32>
    %c0_134 = arith.constant 0 : index
    %c0_135 = arith.constant 0 : index
    %c1_136 = arith.constant 1 : index
    %c1_137 = arith.constant 1 : index
    %c0_138 = arith.constant 0 : index
    %110 = vector.load %arg1[%c0_134, %c0_135, %c1_136, %c1_137, %c0_138] : memref<1x4x9x9x4xbf16, #tpu.memory_space<vmem>>, vector<1x1x8x8x4xbf16>
    %111 = vector.shape_cast %110 : vector<1x1x8x8x4xbf16> to vector<8x8x4xbf16>
    %112 = vector.shape_cast %111 : vector<8x8x4xbf16> to vector<64x4xbf16>
    %c7_139 = arith.constant 7 : index
    %c0_140 = arith.constant 0 : index
    %c0_141 = arith.constant 0 : index
    %113 = vector.load %arg2[%c7_139, %c0_140, %c0_141] : memref<9x4x8xbf16, #tpu.memory_space<vmem>>, vector<1x4x8xbf16>
    %114 = vector.shape_cast %113 : vector<1x4x8xbf16> to vector<4x8xbf16>
    %cst_142 = arith.constant dense<0.000000e+00> : vector<64x8xf32>
    %115 = tpu.matmul %112, %114, %cst_142 {dimension_numbers = #tpu.dot_dimension_numbers<[1], [0], [0], [1], [0, 0, 1, 1], [], []>} : vector<64x4xbf16>, vector<4x8xbf16>, vector<64x8xf32> -> vector<64x8xf32>
    %116 = arith.addf %109, %115 : vector<64x8xf32>
    %c0_143 = arith.constant 0 : index
    %c1_144 = arith.constant 1 : index
    %c1_145 = arith.constant 1 : index
    %c1_146 = arith.constant 1 : index
    %c0_147 = arith.constant 0 : index
    %117 = vector.load %arg1[%c0_143, %c1_144, %c1_145, %c1_146, %c0_147] : memref<1x4x9x9x4xbf16, #tpu.memory_space<vmem>>, vector<1x1x8x8x4xbf16>
    %118 = vector.shape_cast %117 : vector<1x1x8x8x4xbf16> to vector<8x8x4xbf16>
    %119 = vector.shape_cast %118 : vector<8x8x4xbf16> to vector<64x4xbf16>
    %c8_148 = arith.constant 8 : index
    %c0_149 = arith.constant 0 : index
    %c0_150 = arith.constant 0 : index
    %120 = vector.load %arg2[%c8_148, %c0_149, %c0_150] : memref<9x4x8xbf16, #tpu.memory_space<vmem>>, vector<1x4x8xbf16>
    %121 = vector.shape_cast %120 : vector<1x4x8xbf16> to vector<4x8xbf16>
    %cst_151 = arith.constant dense<0.000000e+00> : vector<64x8xf32>
    %122 = tpu.matmul %119, %121, %cst_151 {dimension_numbers = #tpu.dot_dimension_numbers<[1], [0], [0], [1], [0, 0, 1, 1], [], []>} : vector<64x4xbf16>, vector<4x8xbf16>, vector<64x8xf32> -> vector<64x8xf32>
    %123 = arith.addf %116, %122 : vector<64x8xf32>
    %124 = arith.maximumf %61, %123 : vector<64x8xf32>
    %c0_152 = arith.constant 0 : index
    %c2_153 = arith.constant 2 : index
    %c0_154 = arith.constant 0 : index
    %c0_155 = arith.constant 0 : index
    %c0_156 = arith.constant 0 : index
    %125 = vector.load %arg1[%c0_152, %c2_153, %c0_154, %c0_155, %c0_156] : memref<1x4x9x9x4xbf16, #tpu.memory_space<vmem>>, vector<1x1x8x8x4xbf16>
    %126 = vector.shape_cast %125 : vector<1x1x8x8x4xbf16> to vector<8x8x4xbf16>
    %127 = vector.shape_cast %126 : vector<8x8x4xbf16> to vector<64x4xbf16>
    %c0_157 = arith.constant 0 : index
    %c0_158 = arith.constant 0 : index
    %c0_159 = arith.constant 0 : index
    %128 = vector.load %arg2[%c0_157, %c0_158, %c0_159] : memref<9x4x8xbf16, #tpu.memory_space<vmem>>, vector<1x4x8xbf16>
    %129 = vector.shape_cast %128 : vector<1x4x8xbf16> to vector<4x8xbf16>
    %cst_160 = arith.constant dense<0.000000e+00> : vector<64x8xf32>
    %130 = tpu.matmul %127, %129, %cst_160 {dimension_numbers = #tpu.dot_dimension_numbers<[1], [0], [0], [1], [0, 0, 1, 1], [], []>} : vector<64x4xbf16>, vector<4x8xbf16>, vector<64x8xf32> -> vector<64x8xf32>
    %c0_161 = arith.constant 0 : index
    %c3_162 = arith.constant 3 : index
    %c0_163 = arith.constant 0 : index
    %c0_164 = arith.constant 0 : index
    %c0_165 = arith.constant 0 : index
    %131 = vector.load %arg1[%c0_161, %c3_162, %c0_163, %c0_164, %c0_165] : memref<1x4x9x9x4xbf16, #tpu.memory_space<vmem>>, vector<1x1x8x8x4xbf16>
    %132 = vector.shape_cast %131 : vector<1x1x8x8x4xbf16> to vector<8x8x4xbf16>
    %133 = vector.shape_cast %132 : vector<8x8x4xbf16> to vector<64x4xbf16>
    %c1_166 = arith.constant 1 : index
    %c0_167 = arith.constant 0 : index
    %c0_168 = arith.constant 0 : index
    %134 = vector.load %arg2[%c1_166, %c0_167, %c0_168] : memref<9x4x8xbf16, #tpu.memory_space<vmem>>, vector<1x4x8xbf16>
    %135 = vector.shape_cast %134 : vector<1x4x8xbf16> to vector<4x8xbf16>
    %cst_169 = arith.constant dense<0.000000e+00> : vector<64x8xf32>
    %136 = tpu.matmul %133, %135, %cst_169 {dimension_numbers = #tpu.dot_dimension_numbers<[1], [0], [0], [1], [0, 0, 1, 1], [], []>} : vector<64x4xbf16>, vector<4x8xbf16>, vector<64x8xf32> -> vector<64x8xf32>
    %137 = arith.addf %130, %136 : vector<64x8xf32>
    %c0_170 = arith.constant 0 : index
    %c2_171 = arith.constant 2 : index
    %c0_172 = arith.constant 0 : index
    %c1_173 = arith.constant 1 : index
    %c0_174 = arith.constant 0 : index
    %138 = vector.load %arg1[%c0_170, %c2_171, %c0_172, %c1_173, %c0_174] : memref<1x4x9x9x4xbf16, #tpu.memory_space<vmem>>, vector<1x1x8x8x4xbf16>
    %139 = vector.shape_cast %138 : vector<1x1x8x8x4xbf16> to vector<8x8x4xbf16>
    %140 = vector.shape_cast %139 : vector<8x8x4xbf16> to vector<64x4xbf16>
    %c2_175 = arith.constant 2 : index
    %c0_176 = arith.constant 0 : index
    %c0_177 = arith.constant 0 : index
    %141 = vector.load %arg2[%c2_175, %c0_176, %c0_177] : memref<9x4x8xbf16, #tpu.memory_space<vmem>>, vector<1x4x8xbf16>
    %142 = vector.shape_cast %141 : vector<1x4x8xbf16> to vector<4x8xbf16>
    %cst_178 = arith.constant dense<0.000000e+00> : vector<64x8xf32>
    %143 = tpu.matmul %140, %142, %cst_178 {dimension_numbers = #tpu.dot_dimension_numbers<[1], [0], [0], [1], [0, 0, 1, 1], [], []>} : vector<64x4xbf16>, vector<4x8xbf16>, vector<64x8xf32> -> vector<64x8xf32>
    %144 = arith.addf %137, %143 : vector<64x8xf32>
    %c0_179 = arith.constant 0 : index
    %c0_180 = arith.constant 0 : index
    %c1_181 = arith.constant 1 : index
    %c0_182 = arith.constant 0 : index
    %c0_183 = arith.constant 0 : index
    %145 = vector.load %arg1[%c0_179, %c0_180, %c1_181, %c0_182, %c0_183] : memref<1x4x9x9x4xbf16, #tpu.memory_space<vmem>>, vector<1x1x8x8x4xbf16>
    %146 = vector.shape_cast %145 : vector<1x1x8x8x4xbf16> to vector<8x8x4xbf16>
    %147 = vector.shape_cast %146 : vector<8x8x4xbf16> to vector<64x4xbf16>
    %c3_184 = arith.constant 3 : index
    %c0_185 = arith.constant 0 : index
    %c0_186 = arith.constant 0 : index
    %148 = vector.load %arg2[%c3_184, %c0_185, %c0_186] : memref<9x4x8xbf16, #tpu.memory_space<vmem>>, vector<1x4x8xbf16>
    %149 = vector.shape_cast %148 : vector<1x4x8xbf16> to vector<4x8xbf16>
    %cst_187 = arith.constant dense<0.000000e+00> : vector<64x8xf32>
    %150 = tpu.matmul %147, %149, %cst_187 {dimension_numbers = #tpu.dot_dimension_numbers<[1], [0], [0], [1], [0, 0, 1, 1], [], []>} : vector<64x4xbf16>, vector<4x8xbf16>, vector<64x8xf32> -> vector<64x8xf32>
    %151 = arith.addf %144, %150 : vector<64x8xf32>
    %c0_188 = arith.constant 0 : index
    %c1_189 = arith.constant 1 : index
    %c1_190 = arith.constant 1 : index
    %c0_191 = arith.constant 0 : index
    %c0_192 = arith.constant 0 : index
    %152 = vector.load %arg1[%c0_188, %c1_189, %c1_190, %c0_191, %c0_192] : memref<1x4x9x9x4xbf16, #tpu.memory_space<vmem>>, vector<1x1x8x8x4xbf16>
    %153 = vector.shape_cast %152 : vector<1x1x8x8x4xbf16> to vector<8x8x4xbf16>
    %154 = vector.shape_cast %153 : vector<8x8x4xbf16> to vector<64x4xbf16>
    %c4_193 = arith.constant 4 : index
    %c0_194 = arith.constant 0 : index
    %c0_195 = arith.constant 0 : index
    %155 = vector.load %arg2[%c4_193, %c0_194, %c0_195] : memref<9x4x8xbf16, #tpu.memory_space<vmem>>, vector<1x4x8xbf16>
    %156 = vector.shape_cast %155 : vector<1x4x8xbf16> to vector<4x8xbf16>
    %cst_196 = arith.constant dense<0.000000e+00> : vector<64x8xf32>
    %157 = tpu.matmul %154, %156, %cst_196 {dimension_numbers = #tpu.dot_dimension_numbers<[1], [0], [0], [1], [0, 0, 1, 1], [], []>} : vector<64x4xbf16>, vector<4x8xbf16>, vector<64x8xf32> -> vector<64x8xf32>
    %158 = arith.addf %151, %157 : vector<64x8xf32>
    %c0_197 = arith.constant 0 : index
    %c0_198 = arith.constant 0 : index
    %c1_199 = arith.constant 1 : index
    %c1_200 = arith.constant 1 : index
    %c0_201 = arith.constant 0 : index
    %159 = vector.load %arg1[%c0_197, %c0_198, %c1_199, %c1_200, %c0_201] : memref<1x4x9x9x4xbf16, #tpu.memory_space<vmem>>, vector<1x1x8x8x4xbf16>
    %160 = vector.shape_cast %159 : vector<1x1x8x8x4xbf16> to vector<8x8x4xbf16>
    %161 = vector.shape_cast %160 : vector<8x8x4xbf16> to vector<64x4xbf16>
    %c5_202 = arith.constant 5 : index
    %c0_203 = arith.constant 0 : index
    %c0_204 = arith.constant 0 : index
    %162 = vector.load %arg2[%c5_202, %c0_203, %c0_204] : memref<9x4x8xbf16, #tpu.memory_space<vmem>>, vector<1x4x8xbf16>
    %163 = vector.shape_cast %162 : vector<1x4x8xbf16> to vector<4x8xbf16>
    %cst_205 = arith.constant dense<0.000000e+00> : vector<64x8xf32>
    %164 = tpu.matmul %161, %163, %cst_205 {dimension_numbers = #tpu.dot_dimension_numbers<[1], [0], [0], [1], [0, 0, 1, 1], [], []>} : vector<64x4xbf16>, vector<4x8xbf16>, vector<64x8xf32> -> vector<64x8xf32>
    %165 = arith.addf %158, %164 : vector<64x8xf32>
    %c0_206 = arith.constant 0 : index
    %c2_207 = arith.constant 2 : index
    %c1_208 = arith.constant 1 : index
    %c0_209 = arith.constant 0 : index
    %c0_210 = arith.constant 0 : index
    %166 = vector.load %arg1[%c0_206, %c2_207, %c1_208, %c0_209, %c0_210] : memref<1x4x9x9x4xbf16, #tpu.memory_space<vmem>>, vector<1x1x8x8x4xbf16>
    %167 = vector.shape_cast %166 : vector<1x1x8x8x4xbf16> to vector<8x8x4xbf16>
    %168 = vector.shape_cast %167 : vector<8x8x4xbf16> to vector<64x4xbf16>
    %c6_211 = arith.constant 6 : index
    %c0_212 = arith.constant 0 : index
    %c0_213 = arith.constant 0 : index
    %169 = vector.load %arg2[%c6_211, %c0_212, %c0_213] : memref<9x4x8xbf16, #tpu.memory_space<vmem>>, vector<1x4x8xbf16>
    %170 = vector.shape_cast %169 : vector<1x4x8xbf16> to vector<4x8xbf16>
    %cst_214 = arith.constant dense<0.000000e+00> : vector<64x8xf32>
    %171 = tpu.matmul %168, %170, %cst_214 {dimension_numbers = #tpu.dot_dimension_numbers<[1], [0], [0], [1], [0, 0, 1, 1], [], []>} : vector<64x4xbf16>, vector<4x8xbf16>, vector<64x8xf32> -> vector<64x8xf32>
    %172 = arith.addf %165, %171 : vector<64x8xf32>
    %c0_215 = arith.constant 0 : index
    %c3_216 = arith.constant 3 : index
    %c1_217 = arith.constant 1 : index
    %c0_218 = arith.constant 0 : index
    %c0_219 = arith.constant 0 : index
    %173 = vector.load %arg1[%c0_215, %c3_216, %c1_217, %c0_218, %c0_219] : memref<1x4x9x9x4xbf16, #tpu.memory_space<vmem>>, vector<1x1x8x8x4xbf16>
    %174 = vector.shape_cast %173 : vector<1x1x8x8x4xbf16> to vector<8x8x4xbf16>
    %175 = vector.shape_cast %174 : vector<8x8x4xbf16> to vector<64x4xbf16>
    %c7_220 = arith.constant 7 : index
    %c0_221 = arith.constant 0 : index
    %c0_222 = arith.constant 0 : index
    %176 = vector.load %arg2[%c7_220, %c0_221, %c0_222] : memref<9x4x8xbf16, #tpu.memory_space<vmem>>, vector<1x4x8xbf16>
    %177 = vector.shape_cast %176 : vector<1x4x8xbf16> to vector<4x8xbf16>
    %cst_223 = arith.constant dense<0.000000e+00> : vector<64x8xf32>
    %178 = tpu.matmul %175, %177, %cst_223 {dimension_numbers = #tpu.dot_dimension_numbers<[1], [0], [0], [1], [0, 0, 1, 1], [], []>} : vector<64x4xbf16>, vector<4x8xbf16>, vector<64x8xf32> -> vector<64x8xf32>
    %179 = arith.addf %172, %178 : vector<64x8xf32>
    %c0_224 = arith.constant 0 : index
    %c2_225 = arith.constant 2 : index
    %c1_226 = arith.constant 1 : index
    %c1_227 = arith.constant 1 : index
    %c0_228 = arith.constant 0 : index
    %180 = vector.load %arg1[%c0_224, %c2_225, %c1_226, %c1_227, %c0_228] : memref<1x4x9x9x4xbf16, #tpu.memory_space<vmem>>, vector<1x1x8x8x4xbf16>
    %181 = vector.shape_cast %180 : vector<1x1x8x8x4xbf16> to vector<8x8x4xbf16>
    %182 = vector.shape_cast %181 : vector<8x8x4xbf16> to vector<64x4xbf16>
    %c8_229 = arith.constant 8 : index
    %c0_230 = arith.constant 0 : index
    %c0_231 = arith.constant 0 : index
    %183 = vector.load %arg2[%c8_229, %c0_230, %c0_231] : memref<9x4x8xbf16, #tpu.memory_space<vmem>>, vector<1x4x8xbf16>
    %184 = vector.shape_cast %183 : vector<1x4x8xbf16> to vector<4x8xbf16>
    %cst_232 = arith.constant dense<0.000000e+00> : vector<64x8xf32>
    %185 = tpu.matmul %182, %184, %cst_232 {dimension_numbers = #tpu.dot_dimension_numbers<[1], [0], [0], [1], [0, 0, 1, 1], [], []>} : vector<64x4xbf16>, vector<4x8xbf16>, vector<64x8xf32> -> vector<64x8xf32>
    %186 = arith.addf %179, %185 : vector<64x8xf32>
    %187 = arith.maximumf %124, %186 : vector<64x8xf32>
    %c0_233 = arith.constant 0 : index
    %c3_234 = arith.constant 3 : index
    %c0_235 = arith.constant 0 : index
    %c0_236 = arith.constant 0 : index
    %c0_237 = arith.constant 0 : index
    %188 = vector.load %arg1[%c0_233, %c3_234, %c0_235, %c0_236, %c0_237] : memref<1x4x9x9x4xbf16, #tpu.memory_space<vmem>>, vector<1x1x8x8x4xbf16>
    %189 = vector.shape_cast %188 : vector<1x1x8x8x4xbf16> to vector<8x8x4xbf16>
    %190 = vector.shape_cast %189 : vector<8x8x4xbf16> to vector<64x4xbf16>
    %c0_238 = arith.constant 0 : index
    %c0_239 = arith.constant 0 : index
    %c0_240 = arith.constant 0 : index
    %191 = vector.load %arg2[%c0_238, %c0_239, %c0_240] : memref<9x4x8xbf16, #tpu.memory_space<vmem>>, vector<1x4x8xbf16>
    %192 = vector.shape_cast %191 : vector<1x4x8xbf16> to vector<4x8xbf16>
    %cst_241 = arith.constant dense<0.000000e+00> : vector<64x8xf32>
    %193 = tpu.matmul %190, %192, %cst_241 {dimension_numbers = #tpu.dot_dimension_numbers<[1], [0], [0], [1], [0, 0, 1, 1], [], []>} : vector<64x4xbf16>, vector<4x8xbf16>, vector<64x8xf32> -> vector<64x8xf32>
    %c0_242 = arith.constant 0 : index
    %c2_243 = arith.constant 2 : index
    %c0_244 = arith.constant 0 : index
    %c1_245 = arith.constant 1 : index
    %c0_246 = arith.constant 0 : index
    %194 = vector.load %arg1[%c0_242, %c2_243, %c0_244, %c1_245, %c0_246] : memref<1x4x9x9x4xbf16, #tpu.memory_space<vmem>>, vector<1x1x8x8x4xbf16>
    %195 = vector.shape_cast %194 : vector<1x1x8x8x4xbf16> to vector<8x8x4xbf16>
    %196 = vector.shape_cast %195 : vector<8x8x4xbf16> to vector<64x4xbf16>
    %c1_247 = arith.constant 1 : index
    %c0_248 = arith.constant 0 : index
    %c0_249 = arith.constant 0 : index
    %197 = vector.load %arg2[%c1_247, %c0_248, %c0_249] : memref<9x4x8xbf16, #tpu.memory_space<vmem>>, vector<1x4x8xbf16>
    %198 = vector.shape_cast %197 : vector<1x4x8xbf16> to vector<4x8xbf16>
    %cst_250 = arith.constant dense<0.000000e+00> : vector<64x8xf32>
    %199 = tpu.matmul %196, %198, %cst_250 {dimension_numbers = #tpu.dot_dimension_numbers<[1], [0], [0], [1], [0, 0, 1, 1], [], []>} : vector<64x4xbf16>, vector<4x8xbf16>, vector<64x8xf32> -> vector<64x8xf32>
    %200 = arith.addf %193, %199 : vector<64x8xf32>
    %c0_251 = arith.constant 0 : index
    %c3_252 = arith.constant 3 : index
    %c0_253 = arith.constant 0 : index
    %c1_254 = arith.constant 1 : index
    %c0_255 = arith.constant 0 : index
    %201 = vector.load %arg1[%c0_251, %c3_252, %c0_253, %c1_254, %c0_255] : memref<1x4x9x9x4xbf16, #tpu.memory_space<vmem>>, vector<1x1x8x8x4xbf16>
    %202 = vector.shape_cast %201 : vector<1x1x8x8x4xbf16> to vector<8x8x4xbf16>
    %203 = vector.shape_cast %202 : vector<8x8x4xbf16> to vector<64x4xbf16>
    %c2_256 = arith.constant 2 : index
    %c0_257 = arith.constant 0 : index
    %c0_258 = arith.constant 0 : index
    %204 = vector.load %arg2[%c2_256, %c0_257, %c0_258] : memref<9x4x8xbf16, #tpu.memory_space<vmem>>, vector<1x4x8xbf16>
    %205 = vector.shape_cast %204 : vector<1x4x8xbf16> to vector<4x8xbf16>
    %cst_259 = arith.constant dense<0.000000e+00> : vector<64x8xf32>
    %206 = tpu.matmul %203, %205, %cst_259 {dimension_numbers = #tpu.dot_dimension_numbers<[1], [0], [0], [1], [0, 0, 1, 1], [], []>} : vector<64x4xbf16>, vector<4x8xbf16>, vector<64x8xf32> -> vector<64x8xf32>
    %207 = arith.addf %200, %206 : vector<64x8xf32>
    %c0_260 = arith.constant 0 : index
    %c1_261 = arith.constant 1 : index
    %c1_262 = arith.constant 1 : index
    %c0_263 = arith.constant 0 : index
    %c0_264 = arith.constant 0 : index
    %208 = vector.load %arg1[%c0_260, %c1_261, %c1_262, %c0_263, %c0_264] : memref<1x4x9x9x4xbf16, #tpu.memory_space<vmem>>, vector<1x1x8x8x4xbf16>
    %209 = vector.shape_cast %208 : vector<1x1x8x8x4xbf16> to vector<8x8x4xbf16>
    %210 = vector.shape_cast %209 : vector<8x8x4xbf16> to vector<64x4xbf16>
    %c3_265 = arith.constant 3 : index
    %c0_266 = arith.constant 0 : index
    %c0_267 = arith.constant 0 : index
    %211 = vector.load %arg2[%c3_265, %c0_266, %c0_267] : memref<9x4x8xbf16, #tpu.memory_space<vmem>>, vector<1x4x8xbf16>
    %212 = vector.shape_cast %211 : vector<1x4x8xbf16> to vector<4x8xbf16>
    %cst_268 = arith.constant dense<0.000000e+00> : vector<64x8xf32>
    %213 = tpu.matmul %210, %212, %cst_268 {dimension_numbers = #tpu.dot_dimension_numbers<[1], [0], [0], [1], [0, 0, 1, 1], [], []>} : vector<64x4xbf16>, vector<4x8xbf16>, vector<64x8xf32> -> vector<64x8xf32>
    %214 = arith.addf %207, %213 : vector<64x8xf32>
    %c0_269 = arith.constant 0 : index
    %c0_270 = arith.constant 0 : index
    %c1_271 = arith.constant 1 : index
    %c1_272 = arith.constant 1 : index
    %c0_273 = arith.constant 0 : index
    %215 = vector.load %arg1[%c0_269, %c0_270, %c1_271, %c1_272, %c0_273] : memref<1x4x9x9x4xbf16, #tpu.memory_space<vmem>>, vector<1x1x8x8x4xbf16>
    %216 = vector.shape_cast %215 : vector<1x1x8x8x4xbf16> to vector<8x8x4xbf16>
    %217 = vector.shape_cast %216 : vector<8x8x4xbf16> to vector<64x4xbf16>
    %c4_274 = arith.constant 4 : index
    %c0_275 = arith.constant 0 : index
    %c0_276 = arith.constant 0 : index
    %218 = vector.load %arg2[%c4_274, %c0_275, %c0_276] : memref<9x4x8xbf16, #tpu.memory_space<vmem>>, vector<1x4x8xbf16>
    %219 = vector.shape_cast %218 : vector<1x4x8xbf16> to vector<4x8xbf16>
    %cst_277 = arith.constant dense<0.000000e+00> : vector<64x8xf32>
    %220 = tpu.matmul %217, %219, %cst_277 {dimension_numbers = #tpu.dot_dimension_numbers<[1], [0], [0], [1], [0, 0, 1, 1], [], []>} : vector<64x4xbf16>, vector<4x8xbf16>, vector<64x8xf32> -> vector<64x8xf32>
    %221 = arith.addf %214, %220 : vector<64x8xf32>
    %c0_278 = arith.constant 0 : index
    %c1_279 = arith.constant 1 : index
    %c1_280 = arith.constant 1 : index
    %c1_281 = arith.constant 1 : index
    %c0_282 = arith.constant 0 : index
    %222 = vector.load %arg1[%c0_278, %c1_279, %c1_280, %c1_281, %c0_282] : memref<1x4x9x9x4xbf16, #tpu.memory_space<vmem>>, vector<1x1x8x8x4xbf16>
    %223 = vector.shape_cast %222 : vector<1x1x8x8x4xbf16> to vector<8x8x4xbf16>
    %224 = vector.shape_cast %223 : vector<8x8x4xbf16> to vector<64x4xbf16>
    %c5_283 = arith.constant 5 : index
    %c0_284 = arith.constant 0 : index
    %c0_285 = arith.constant 0 : index
    %225 = vector.load %arg2[%c5_283, %c0_284, %c0_285] : memref<9x4x8xbf16, #tpu.memory_space<vmem>>, vector<1x4x8xbf16>
    %226 = vector.shape_cast %225 : vector<1x4x8xbf16> to vector<4x8xbf16>
    %cst_286 = arith.constant dense<0.000000e+00> : vector<64x8xf32>
    %227 = tpu.matmul %224, %226, %cst_286 {dimension_numbers = #tpu.dot_dimension_numbers<[1], [0], [0], [1], [0, 0, 1, 1], [], []>} : vector<64x4xbf16>, vector<4x8xbf16>, vector<64x8xf32> -> vector<64x8xf32>
    %228 = arith.addf %221, %227 : vector<64x8xf32>
    %c0_287 = arith.constant 0 : index
    %c3_288 = arith.constant 3 : index
    %c1_289 = arith.constant 1 : index
    %c0_290 = arith.constant 0 : index
    %c0_291 = arith.constant 0 : index
    %229 = vector.load %arg1[%c0_287, %c3_288, %c1_289, %c0_290, %c0_291] : memref<1x4x9x9x4xbf16, #tpu.memory_space<vmem>>, vector<1x1x8x8x4xbf16>
    %230 = vector.shape_cast %229 : vector<1x1x8x8x4xbf16> to vector<8x8x4xbf16>
    %231 = vector.shape_cast %230 : vector<8x8x4xbf16> to vector<64x4xbf16>
    %c6_292 = arith.constant 6 : index
    %c0_293 = arith.constant 0 : index
    %c0_294 = arith.constant 0 : index
    %232 = vector.load %arg2[%c6_292, %c0_293, %c0_294] : memref<9x4x8xbf16, #tpu.memory_space<vmem>>, vector<1x4x8xbf16>
    %233 = vector.shape_cast %232 : vector<1x4x8xbf16> to vector<4x8xbf16>
    %cst_295 = arith.constant dense<0.000000e+00> : vector<64x8xf32>
    %234 = tpu.matmul %231, %233, %cst_295 {dimension_numbers = #tpu.dot_dimension_numbers<[1], [0], [0], [1], [0, 0, 1, 1], [], []>} : vector<64x4xbf16>, vector<4x8xbf16>, vector<64x8xf32> -> vector<64x8xf32>
    %235 = arith.addf %228, %234 : vector<64x8xf32>
    %c0_296 = arith.constant 0 : index
    %c2_297 = arith.constant 2 : index
    %c1_298 = arith.constant 1 : index
    %c1_299 = arith.constant 1 : index
    %c0_300 = arith.constant 0 : index
    %236 = vector.load %arg1[%c0_296, %c2_297, %c1_298, %c1_299, %c0_300] : memref<1x4x9x9x4xbf16, #tpu.memory_space<vmem>>, vector<1x1x8x8x4xbf16>
    %237 = vector.shape_cast %236 : vector<1x1x8x8x4xbf16> to vector<8x8x4xbf16>
    %238 = vector.shape_cast %237 : vector<8x8x4xbf16> to vector<64x4xbf16>
    %c7_301 = arith.constant 7 : index
    %c0_302 = arith.constant 0 : index
    %c0_303 = arith.constant 0 : index
    %239 = vector.load %arg2[%c7_301, %c0_302, %c0_303] : memref<9x4x8xbf16, #tpu.memory_space<vmem>>, vector<1x4x8xbf16>
    %240 = vector.shape_cast %239 : vector<1x4x8xbf16> to vector<4x8xbf16>
    %cst_304 = arith.constant dense<0.000000e+00> : vector<64x8xf32>
    %241 = tpu.matmul %238, %240, %cst_304 {dimension_numbers = #tpu.dot_dimension_numbers<[1], [0], [0], [1], [0, 0, 1, 1], [], []>} : vector<64x4xbf16>, vector<4x8xbf16>, vector<64x8xf32> -> vector<64x8xf32>
    %242 = arith.addf %235, %241 : vector<64x8xf32>
    %c0_305 = arith.constant 0 : index
    %c3_306 = arith.constant 3 : index
    %c1_307 = arith.constant 1 : index
    %c1_308 = arith.constant 1 : index
    %c0_309 = arith.constant 0 : index
    %243 = vector.load %arg1[%c0_305, %c3_306, %c1_307, %c1_308, %c0_309] : memref<1x4x9x9x4xbf16, #tpu.memory_space<vmem>>, vector<1x1x8x8x4xbf16>
    %244 = vector.shape_cast %243 : vector<1x1x8x8x4xbf16> to vector<8x8x4xbf16>
    %245 = vector.shape_cast %244 : vector<8x8x4xbf16> to vector<64x4xbf16>
    %c8_310 = arith.constant 8 : index
    %c0_311 = arith.constant 0 : index
    %c0_312 = arith.constant 0 : index
    %246 = vector.load %arg2[%c8_310, %c0_311, %c0_312] : memref<9x4x8xbf16, #tpu.memory_space<vmem>>, vector<1x4x8xbf16>
    %247 = vector.shape_cast %246 : vector<1x4x8xbf16> to vector<4x8xbf16>
    %cst_313 = arith.constant dense<0.000000e+00> : vector<64x8xf32>
    %248 = tpu.matmul %245, %247, %cst_313 {dimension_numbers = #tpu.dot_dimension_numbers<[1], [0], [0], [1], [0, 0, 1, 1], [], []>} : vector<64x4xbf16>, vector<4x8xbf16>, vector<64x8xf32> -> vector<64x8xf32>
    %249 = arith.addf %242, %248 : vector<64x8xf32>
    %250 = arith.maximumf %187, %249 : vector<64x8xf32>
    %c0_314 = arith.constant 0 : index
    %c0_315 = arith.constant 0 : index
    %251 = vector.load %arg3[%c0_314, %c0_315] : memref<1x8xf32, #tpu.memory_space<vmem>>, vector<1x8xf32>
    %252 = vector.broadcast %251 : vector<1x8xf32> to vector<64x8xf32>
    %253 = arith.addf %250, %252 : vector<64x8xf32>
    %cst_316 = arith.constant 0.000000e+00 : f32
    %254 = vector.broadcast %cst_316 : f32 to vector<64x8xf32>
    %255 = arith.maximumf %253, %254 : vector<64x8xf32>
    %256 = arith.truncf %255 : vector<64x8xf32> to vector<64x8xbf16>
    %c0_317 = arith.constant 0 : index
    %c0_318 = arith.constant 0 : index
    %c0_319 = arith.constant 0 : index
    %257 = vector.load %arg4[%c0_317, %c0_318, %c0_319] : memref<1x64x8xbf16, #tpu.memory_space<vmem>>, vector<1x64x8xbf16>
    %258 = vector.shape_cast %257 : vector<1x64x8xbf16> to vector<64x8xbf16>
    %259 = vector.shape_cast %256 : vector<64x8xbf16> to vector<1x64x8xbf16>
    tpu.vector_store %arg4[%c0_317, %c0_318, %c0_319], %259 {strides = array<i32>} : memref<1x64x8xbf16, #tpu.memory_space<vmem>>, vector<1x64x8xbf16>,
    return
  }
  func.func @transform_0(%arg0: i32) -> (i32, i32, i32, i32, i32) {
    %c0_i32 = arith.constant 0 : i32
    %c0_i32_0 = arith.constant 0 : i32
    %c0_i32_1 = arith.constant 0 : i32
    %c0_i32_2 = arith.constant 0 : i32
    %c0_i32_3 = arith.constant 0 : i32
    return %arg0, %c0_i32, %c0_i32_0, %c0_i32_1, %c0_i32_2 : i32, i32, i32, i32, i32
  }
  func.func @transform_1(%arg0: i32) -> (i32, i32, i32) {
    %c0_i32 = arith.constant 0 : i32
    %c0_i32_0 = arith.constant 0 : i32
    %c0_i32_1 = arith.constant 0 : i32
    %c0_i32_2 = arith.constant 0 : i32
    return %c0_i32, %c0_i32_0, %c0_i32_1 : i32, i32, i32
  }
  func.func @transform_2(%arg0: i32) -> (i32, i32) {
    %c0_i32 = arith.constant 0 : i32
    %c0_i32_0 = arith.constant 0 : i32
    %c0_i32_1 = arith.constant 0 : i32
    return %c0_i32, %c0_i32_0 : i32, i32
  }
  func.func @transform_3(%arg0: i32) -> (i32, i32, i32) {
    %c0_i32 = arith.constant 0 : i32
    %c0_i32_0 = arith.constant 0 : i32
    %c0_i32_1 = arith.constant 0 : i32
    return %arg0, %c0_i32, %c0_i32_0 : i32, i32, i32
  }
}

</mosaic_0001>

<bundles_post_ra>
// kernel: conv_block_forward.1
= control target key start
LH: loop header
LB: loop body
LE: loop exit
PB: predicated region body
PF: predicated region fallthrough
CT: control target
= control target key end

     0   :  { %s5794_s12 = smov 0   ;;  %s6683_s0 = inlined_call_operand.vmem [shape: bf16[2,4,9,9,4], index: 0, kind: input, shape index: {}]   ;;  %s6684_s1 = inlined_call_operand.vmem [shape: bf16[9,4,8], index: 1, kind: input, shape index: {}]   ;;  %s6685_s2 = inlined_call_operand.vmem [shape: f32[1,8], index: 2, kind: input, shape index: {}]   ;;  %s6686_s3 = inlined_call_operand.vmem [shape: bf16[2,64,8], index: 3, kind: output, shape index: {}]  }
   0x1 LB: > { %s4471_s13 = sadd.s32 4294967295, %s5772_s12   ;;  %p4475_p0 = scmp.ge.s32.totalorder %s5772_s12, 1  ;;  %s5772_s12 = sphi %s5794_s12, %s13_s12  }
   0x2   : > { %p137_p1 = scmp.lt.s32.totalorder %s5772_s12, 3 }
   0x4   : > { %p138_p2 = pnand %p4475_p0, %p137_p1 }
   0x6   : > { %141 = sbr.rel (%p138_p2) target bundleno = 543 (0x21f), region = 32 }
   0xd   : > { %v4487_v0 = vld [vmem:[%s6684_s1 + $0x2] sm:$0x3]  ;;  %vm225_vm0 = vcmask 1041408   ;;  %p161_p3 = scmp.lt.s32.totalorder %s4471_s13, 1  ;;  %v180_v2 = vld [vmem:[%s6684_s1] sm:$0x3] }
   0xe   : > { %5679 = vmatprep.subr.msk.bf16.mxu0 %vm225_vm0, %v4487_v0  ;;  %v5807_v1 = vsel %vm225_vm0, %v4487_v0, 0  ;;  %5688 = vmatprep.subr.msk.bf16.mxu1 %vm225_vm0, %v4487_v0  ;;  %vm212_vm1 = vcmask 31744   ;;  %v5826_v3 = vsel %vm225_vm0, %v180_v2, 0  ;;  %vm410_vm2 = vsmask.f32 3328 }
   0xf   : > { %5064 = vmatpush3.bf16.msra.mxu0 %v5807_v1  ;;  %s6709_s13 = smov (!%p161_p3, %s4471_s13), 1  ;;  %5154 = vmatpush3.bf16.msra.mxu1 %v5807_v1  ;;  %vm411_vm3 = vsmask.f32 7440  ;;  %v5831_v4 = vld [vmem:[%s6684_s1 + $0x4] sm:$0x3]  ;;  %vm4407_vm5 = vcmask 60416  }
  0x10   : > { %5680 = vmatprep.subr.msk.bf16.mxu0 %vm225_vm0, %v180_v2  ;;  %5689 = vmatprep.subr.msk.bf16.mxu1 %vm225_vm0, %v180_v2  ;;  %s5715_s18 = smul.u32 288, %s6709_s13  ;;  %v5848_v8 = vsel %vm225_vm0, %v5831_v4, 0  ;;  %vm5868_vm4 = vmor %vm410_vm2, %vm411_vm3  ;;  %s4874_s27 = sshll.u32 %s6709_s13, 5 }
  0x11   : > { %s6662_s30 = scalar_lea.vmem %s6686_s3, %s4874_s27 }
  0x12   : > { %s5823_s21 = scalar_lea.vmem %s6683_s0, %s5715_s18 }
  0x13   : > { %v5834_v5 = vld [vmem:[%s5823_s21 + $0x48] ss:$8 sps:$4 sm:$0xff]   ;;  %v5837_v6 = vld [vmem:[%s5823_s21 + $0x58] ss:$8 sps:$4 sm:$0xff]   ;;  %v395_v10 = vld [vmem:[%s5823_s21 + $0x4] sm:$0x1] }
  0x14   : > { %5065 = vmatprep.mubr.msk.bf16.mxu0 %vm212_vm1, %v5834_v5  ;;  %v5842_v7 = vld [vmem:[%s5823_s21 + $0x68] ss:$8 sps:$4 sm:$0xff]   ;;  %v394_v9 = vld [vmem:[%s5823_s21] sm:$0xf]  ;;  %v397_v13 = vld [vmem:[%s5823_s21 + $0xc] sm:$0x1] }
  0x15   : > { %5066 = vmatmul.mubr.msk.bf16.vlgmr.msra.gmra.mrb[0].mxu0 %vm212_vm1, %v5837_v6  ;;  %v396_v11 = vld [vmem:[%s5823_s21 + $0x8] sm:$0xf]  ;;  %v5857_v12 = vld [vmem:[%s5823_s21 + $0x78] ss:$8 sps:$4 sm:$0xff]   ;;  %v414_v14 = vshrl.u32 %v394_v9, 16  ;;  %v417_v15 = vshll.u32 %v394_v9, 16 }
  0x16   : > { %5069 = vmatprep.mubr.msk.bf16.mxu0 %vm212_vm1, %v5842_v7  ;;  %5074 = vmatpush3.bf16.msra.mxu0 %v5826_v3  ;;  %v423_v16 = vshll.u32 %v395_v10, 16  ;;  %v428_v17 = vshrl.u32 %v396_v11, 16  ;;  %v431_v18 = vshll.u32 %v396_v11, 16  ;;  %v437_v19 = vshll.u32 %v397_v13, 16  ;;  %v398_v20 = vld [vmem:[%s5823_s21 + $0x10] sm:$0xf] }
  0x17   : > { %5681 = vmatprep.subr.msk.bf16.mxu0 %vm225_vm0, %v5831_v4  ;;  %v399_v21 = vld [vmem:[%s5823_s21 + $0x14] sm:$0x1]  ;;  %v416_v22 = vrot.slane %v414_v14, 4  ;;  %v419_v23 = vrot.slane %v417_v15, 5  ;;  %v400_v26 = vld [vmem:[%s5823_s21 + $0x18] sm:$0xf] }
  0x18   : > { %v425_v24 = vrot.slane %v423_v16, 5  ;;  %v430_v25 = vrot.slane %v428_v17, 4  ;;  %v433_v27 = vrot.slane %v431_v18, 5  ;;  %v439_v28 = vrot.slane %v437_v19, 5  ;;  %v401_v29 = vld [vmem:[%s5823_s21 + $0x1c] sm:$0x1] }
  0x19   : > { %v442_v30 = vshrl.u32 %v398_v20, 16  ;;  %v445_v31 = vshll.u32 %v398_v20, 16  ;;  %v420_v32 = vor.u32 %v419_v23, %v416_v22  ;;  %v451_v33 = vshll.u32 %v399_v21, 16  ;;  %v5728_v45 = vld [vmem:[%s5823_s21] ss:$8 sps:$4 sm:$0xff]  }
  0x1a   : > { %v456_v34 = vshrl.u32 %v400_v26, 16  ;;  %v459_v35 = vshll.u32 %v400_v26, 16  ;;  %v434_v37 = vor.u32 %v433_v27, %v430_v25  ;;  %v465_v40 = vshll.u32 %v401_v29, 16  ;;  %v5729_v51 = vld [vmem:[%s5823_s21 + $0x10] ss:$8 sps:$4 sm:$0xff]  }
  0x1b   : > { %v444_v38 = vrot.slane %v442_v30, 4  ;;  %v447_v39 = vrot.slane %v445_v31, 5  ;;  %v421_v41 = vrot.slane %v420_v32, 4  ;;  %v453_v42 = vrot.slane %v451_v33, 5  ;;  %v402_v52 = vld [vmem:[%s5823_s21 + $0x20] sm:$0xf] }
  0x1c   : > { %v458_v43 = vrot.slane %v456_v34, 4  ;;  %v461_v44 = vrot.slane %v459_v35, 5  ;;  %v435_v46 = vrot.slane %v434_v37, 4  ;;  %v467_v48 = vrot.slane %v465_v40, 5  ;;  %v403_v53 = vld [vmem:[%s5823_s21 + $0x24] sm:$0x1] }
  0x1d   : > { %5070 = vmatmul.mubr.msk.bf16.gmra.mrb[4].mxu0 %vm212_vm1, %v5857_v12  ;;  %v448_v47 = vor.u32 %v447_v39, %v444_v38  ;;  %v426_v49 = vsel %vm5868_vm4, %v421_v41, %v425_v24  ;;  %v404_v56 = vld [vmem:[%s5823_s21 + $0x28] sm:$0xf]  ;;  %v405_v57 = vld [vmem:[%s5823_s21 + $0x2c] sm:$0x1]  ;;  %v470_v58 = vshrl.u32 %v402_v52, 16  ;;  %v473_v61 = vshll.u32 %v402_v52, 16 }
  0x1e   : > { %v462_v50 = vor.u32 %v461_v44, %v458_v43  ;;  %5075 = vmatprep.mubr.msk.bf16.mxu0 %vm212_vm1, %v5728_v45  ;;  %v440_v54 = vsel %vm5868_vm4, %v435_v46, %v439_v28  ;;  %v479_v62 = vshll.u32 %v403_v53, 16  ;;  %v406_v63 = vld [vmem:[%s5823_s21 + $0x30] sm:$0xf]  ;;  %v484_v9 = vshrl.u32 %v404_v56, 16  ;;  %v407_v11 = vld [vmem:[%s5823_s21 + $0x34] sm:$0x1] }
  0x1f   : > { %v449_v55 = vrot.slane %v448_v47, 4  ;;  %v5885_v59 = vcombine.low %v426_v49, %v440_v54  ;;  %v472_v2 = vrot.slane %v470_v58, 4  ;;  %v487_v10 = vshll.u32 %v404_v56, 16  ;;  %v5894_v13 = vld [vmem:[%s6684_s1 + $0x6] sm:$0x3] }
  0x20   : > { %v463_v60 = vrot.slane %v462_v50, 4  ;;  %v475_v15 = vrot.slane %v473_v61, 5  ;;  %v481_v16 = vrot.slane %v479_v62, 5  ;;  %v493_v17 = vshll.u32 %v405_v57, 16  ;;  %v408_v18 = vld [vmem:[%s5823_s21 + $0x38] sm:$0xf] }
  0x21   : > { %v454_v0 = vsel %vm5868_vm4, %v449_v55, %v453_v42  ;;  %5155 = vmatprep.mubr.msk.bf16.mxu1 %vm212_vm1, %v5885_v59  ;;  %v486_v20 = vrot.slane %v484_v9, 4  ;;  %v489_v21 = vrot.slane %v487_v10, 5  ;;  %v409_v22 = vld [vmem:[%s5823_s21 + $0x3c] sm:$0x1]  ;;  %v498_v23 = vshrl.u32 %v406_v63, 16 }
  0x22   : > { %v468_v14 = vsel %vm5868_vm4, %v463_v60, %v467_v48  ;;  %v476_v24 = vor.u32 %v475_v15, %v472_v2  ;;  %v495_v25 = vrot.slane %v493_v17, 5  ;;  %v501_v26 = vshll.u32 %v406_v63, 16  ;;  %v5730_v35 = vld [vmem:[%s5823_s21 + $0x20] ss:$8 sps:$4 sm:$0xff]   ;;  %v5731_v43 = vld [vmem:[%s5823_s21 + $0x30] ss:$8 sps:$4 sm:$0xff]  }
  0x23   : > { %v5901_v19 = vcombine.low %v454_v0, %v468_v14  ;;  %v507_v27 = vshll.u32 %v407_v11, 16  ;;  %v490_v28 = vor.u32 %v489_v21, %v486_v20  ;;  %v500_v29 = vrot.slane %v498_v23, 4  ;;  %v4639_v47 = vld [vmem:[%s5823_s21 + $0x48] sm:$0xf]  ;;  %v4641_v48 = vld [vmem:[%s5823_s21 + $0x50] sm:$0xf] }
  0x24   : > { %v512_v30 = vshrl.u32 %v408_v18, 16  ;;  %v515_v31 = vshll.u32 %v408_v18, 16  ;;  %v477_v32 = vrot.slane %v476_v24, 4  ;;  %v503_v33 = vrot.slane %v501_v26, 5  ;;  %v4642_v54 = vld [vmem:[%s5823_s21 + $0x54] sm:$0x1] }
  0x25   : > { %5076 = vmatmul.mubr.msk.bf16.vlgmr.msra.gmra.mrb[0].mxu0 %vm212_vm1, %v5729_v51  ;;  %5156 = vmatmul.mubr.msk.bf16.vlgmr.msra.gmra.mrb[0].mxu1 %vm212_vm1, %v5901_v19  ;;  %v521_v34 = vshll.u32 %v409_v22, 16  ;;  %v491_v37 = vrot.slane %v490_v28, 4  ;;  %v509_v42 = vrot.slane %v507_v27, 5  ;;  %v1710_v51 = vshrl.u32 %v4639_v47, 16  ;;  %v4643_v61 = vld [vmem:[%s5823_s21 + $0x58] sm:$0xf] }
  0x26   : > { %5084 = vmatpush3.bf16.msra.mxu0 %v5848_v8  ;;  %5164 = vmatpush3.bf16.msra.mxu1 %v5826_v3  ;;  %v514_v38 = vrot.slane %v512_v30, 4  ;;  %v517_v39 = vrot.slane %v515_v31, 5  ;;  %v482_v40 = vsel %vm5868_vm4, %v477_v32, %v481_v16  ;;  %v504_v41 = vor.u32 %v503_v33, %v500_v29  ;;  %v4645_v14 = vld [vmem:[%s5823_s21 + $0x60] sm:$0xf]  ;;  %v4644_v15 = vld [vmem:[%s5823_s21 + $0x5c] sm:$0x1] }
  0x27   : > { %5682 = vmatprep.subr.msk.bf16.mxu0 %vm225_vm0, %v5894_v13  ;;  %5690 = vmatprep.subr.msk.bf16.mxu1 %vm225_vm0, %v5831_v4  ;;  %v496_v44 = vsel %vm5868_vm4, %v491_v37, %v495_v25  ;;  %v523_v46 = vrot.slane %v521_v34, 5  ;;  %v4640_v4 = vld [vmem:[%s5823_s21 + $0x4c] sm:$0x1]  ;;  %v1713_v52 = vshll.u32 %v4639_v47, 16  ;;  %v1724_v55 = vshrl.u32 %v4641_v48, 16 }
  0x28   : > { %5079 = vmatprep.mubr.msk.bf16.mxu0 %vm212_vm1, %v5730_v35  ;;  %v518_v45 = vor.u32 %v517_v39, %v514_v38  ;;  %v4507_v49 = vcombine.low %v482_v40, %v496_v44  ;;  %v505_v50 = vrot.slane %v504_v41, 4  ;;  %v1727_v56 = vshll.u32 %v4641_v48, 16  ;;  %v4646_v18 = vld [vmem:[%s5823_s21 + $0x64] sm:$0x1]  ;;  %v5949_v23 = vld [vmem:[%s6684_s1 + $0x8] sm:$0x3] }
  0x29   : > { %v1712_v58 = vrot.slane %v1710_v51, 4  ;;  %v1715_v60 = vrot.slane %v1713_v52, 5  ;;  %v1726_v63 = vrot.slane %v1724_v55, 4  ;;  %v1719_v10 = vshll.u32 %v4640_v4, 16  ;;  %v4649_v30 = vld [vmem:[%s5823_s21 + $0x70] sm:$0xf] }
  0x2a   : > { %v519_v53 = vrot.slane %v518_v45, 4  ;;  %5159 = vmatprep.mubr.msk.bf16.mxu1 %vm212_vm1, %v4507_v49  ;;  %v510_v57 = vsel %vm5868_vm4, %v505_v50, %v509_v42  ;;  %v1729_v0 = vrot.slane %v1727_v56, 5  ;;  %v1733_v11 = vshll.u32 %v4642_v54, 16  ;;  %v4651_v40 = vld [vmem:[%s5823_s21 + $0x78] sm:$0xf] }
  0x2b   : > { %v1716_v9 = vor.u32 %v1715_v60, %v1712_v58  ;;  %v1738_v16 = vshrl.u32 %v4643_v61, 16  ;;  %v1741_v20 = vshll.u32 %v4643_v61, 16  ;;  %v1752_v21 = vshrl.u32 %v4645_v14, 16  ;;  %v4648_v41 = vld [vmem:[%s5823_s21 + $0x6c] sm:$0x1] }
  0x2c   : > { %v524_v62 = vsel %vm5868_vm4, %v519_v53, %v523_v46  ;;  %v1730_v17 = vor.u32 %v1729_v0, %v1726_v63  ;;  %v1755_v22 = vshll.u32 %v4645_v14, 16  ;;  %v1721_v25 = vrot.slane %v1719_v10, 5  ;;  %v4650_v42 = vld [vmem:[%s5823_s21 + $0x74] sm:$0x1]  ;;  %v5732_v46 = vld [vmem:[%s5823_s21 + $0x90] ss:$8 sps:$4 sm:$0xff]  }
  0x2d   : > { %5080 = vmatmul.mubr.msk.bf16.gmra.mrb[4].mxu0 %vm212_vm1, %v5731_v43  ;;  %v5933_v2 = vcombine.low %v510_v57, %v524_v62  ;;  %v1717_v24 = vrot.slane %v1716_v9, 4  ;;  %v1735_v26 = vrot.slane %v1733_v11, 5  ;;  %v1747_v27 = vshll.u32 %v4644_v15, 16  ;;  %v4652_v61 = vld [vmem:[%s5823_s21 + $0x7c] sm:$0x1] }
  0x2e   : > { %5085 = vmatprep.mubr.msk.bf16.mxu0 %vm212_vm1, %v5885_v59  ;;  %v5944_v59 = vsel %vm225_vm0, %v5894_v13, 0  ;;  %v1740_v28 = vrot.slane %v1738_v16, 4  ;;  %v1761_v29 = vshll.u32 %v4646_v18, 16  ;;  %v1731_v31 = vrot.slane %v1730_v17, 4  ;;  %v4654_v62 = vld [vmem:[%s5823_s21 + $0x84] sm:$0x1] }
  0x2f   : > { %5160 = vmatmul.mubr.msk.bf16.gmra.mrb[4].mxu1 %vm212_vm1, %v5933_v2  ;;  %v1743_v32 = vrot.slane %v1741_v20, 5  ;;  %v1754_v35 = vrot.slane %v1752_v21, 4  ;;  %v1757_v37 = vrot.slane %v1755_v22, 5  ;;  %v1780_v38 = vshrl.u32 %v4649_v30, 16 }
  0x30   : > { %5165 = vmatprep.mubr.msk.bf16.mxu1 %vm212_vm1, %v5834_v5  ;;  %v4647_v5 = vld [vmem:[%s5823_s21 + $0x68] sm:$0xf]  ;;  %v1783_v39 = vshll.u32 %v4649_v30, 16  ;;  %v1749_v45 = vrot.slane %v1747_v27, 5  ;;  %v1736_v50 = vsel %vm5868_vm4, %v1731_v31, %v1735_v26  ;;  %v1763_v51 = vrot.slane %v1761_v29, 5 }
  0x31   : > { %v1766_v33 = vshrl.u32 %v4647_v5, 16  ;;  %v1769_v34 = vshll.u32 %v4647_v5, 16  ;;  %v1782_v47 = vrot.slane %v1780_v38, 4  ;;  %v1744_v4 = vor.u32 %v1743_v32, %v1740_v28  ;;  %v5734_v26 = vld [vmem:[%s5823_s21 + $0xb0] ss:$8 sps:$4 sm:$0xff]  }
  0x32   : > { %v1785_v48 = vrot.slane %v1783_v39, 5  ;;  %v1794_v52 = vshrl.u32 %v4651_v40, 16  ;;  %v1758_v53 = vor.u32 %v1757_v37, %v1754_v35  ;;  %v1775_v54 = vshll.u32 %v4648_v41, 16  ;;  %v6000_v29 = vld [vmem:[%s6684_s1 + $0xa] sm:$0x3] }
  0x33   : > { %v1768_v43 = vrot.slane %v1766_v33, 4  ;;  %v1771_v44 = vrot.slane %v1769_v34, 5  ;;  %v1789_v55 = vshll.u32 %v4650_v42, 16  ;;  %v1797_v56 = vshll.u32 %v4651_v40, 16  ;;  %v4547_v33 = vld [vmem:[%s5823_s21 + $0x90] sm:$0xf] }
  0x34   : > { %v1786_v57 = vor.u32 %v1785_v48, %v1782_v47  ;;  %v1796_v63 = vrot.slane %v1794_v52, 4  ;;  %v1745_v11 = vrot.slane %v1744_v4, 4  ;;  %v1759_v14 = vrot.slane %v1758_v53, 4  ;;  %v4549_v35 = vld [vmem:[%s5823_s21 + $0x98] sm:$0xf] }
  0x35   : > { %5086 = vmatmul.mubr.msk.bf16.vlgmr.msra.gmra.mrb[0].mxu0 %vm212_vm1, %v5901_v19  ;;  %v1722_v19 = vsel %vm5868_vm4, %v1717_v24, %v1721_v25  ;;  %v1799_v0 = vrot.slane %v1797_v56, 5  ;;  %v1791_v15 = vrot.slane %v1789_v55, 5  ;;  %v1803_v20 = vshll.u32 %v4652_v61, 16  ;;  %v4551_v38 = vld [vmem:[%s5823_s21 + $0xa0] sm:$0xf] }
  0x36   : > { %5089 = vmatprep.mubr.msk.bf16.mxu0 %vm212_vm1, %v4507_v49  ;;  %5094 = vmatpush3.bf16.msra.mxu0 %v5944_v59  ;;  %v4653_v49 = vld [vmem:[%s5823_s21 + $0x80] sm:$0xf]  ;;  %v1787_v17 = vrot.slane %v1786_v57, 4  ;;  %v1817_v22 = vshll.u32 %v4654_v62, 16  ;;  %v1750_v24 = vsel %vm5868_vm4, %v1745_v11, %v1749_v45  ;;  %v1764_v25 = vsel %vm5868_vm4, %v1759_v14, %v1763_v51  ;;  %v4553_v39 = vld [vmem:[%s5823_s21 + $0xa8] sm:$0xf] }
  0x37   : > { %5683 = vmatprep.subr.msk.bf16.mxu0 %vm225_vm0, %v5949_v23  ;;  %5166 = vmatmul.mubr.msk.bf16.vlgmr.msra.gmra.mrb[0].mxu1 %vm212_vm1, %v5837_v6  ;;  %v1772_v6 = vor.u32 %v1771_v44, %v1768_v43  ;;  %v1808_v58 = vshrl.u32 %v4653_v49, 16  ;;  %v1811_v60 = vshll.u32 %v4653_v49, 16  ;;  %v1800_v18 = vor.u32 %v1799_v0, %v1796_v63  ;;  %v6016_v44 = vld [vmem:[%s5823_s21 + $0xc0] ss:$8 sps:$4 sm:$0xff]   ;;  %v4548_v51 = vld [vmem:[%s5823_s21 + $0x94] sm:$0x1] }
  0x38   : > { %5174 = vmatpush3.bf16.msra.mxu1 %v5848_v8  ;;  %5169 = vmatprep.mubr.msk.bf16.mxu1 %vm212_vm1, %v5842_v7  ;;  %v4655_v7 = vcombine.low %v1722_v19, %v1736_v50  ;;  %v1792_v28 = vsel %vm5868_vm4, %v1787_v17, %v1791_v15  ;;  %v1805_v30 = vrot.slane %v1803_v20, 5  ;;  %v1819_v32 = vrot.slane %v1817_v22, 5  ;;  %v4555_v50 = vld [vmem:[%s5823_s21 + $0xb0] sm:$0xf]  ;;  %v6023_v4 = vld [vmem:[%s5823_s21 + $0xd8] ss:$8 sps:$4 sm:$0xff]  }
  0x39   : > { %5691 = vmatprep.subr.msk.bf16.mxu1 %vm225_vm0, %v5894_v13  ;;  %v1810_v9 = vrot.slane %v1808_v58, 4  ;;  %v1813_v10 = vrot.slane %v1811_v60, 5  ;;  %v1777_v13 = vrot.slane %v1775_v54, 5  ;;  %v1773_v16 = vrot.slane %v1772_v6, 4  ;;  %v4550_v52 = vld [vmem:[%s5823_s21 + $0x9c] sm:$0x1] }
  0x3a   : > { %v1801_v5 = vrot.slane %v1800_v18, 4  ;;  %v4656_v34 = vcombine.low %v1750_v24, %v1764_v25  ;;  %v882_v40 = vshrl.u32 %v4547_v33, 16  ;;  %v885_v41 = vshll.u32 %v4547_v33, 16  ;;  %v4552_v56 = vld [vmem:[%s5823_s21 + $0xa4] sm:$0x1] }
  0x3b   : > { %v1814_v21 = vor.u32 %v1813_v10, %v1810_v9  ;;  %v1778_v27 = vsel %vm5868_vm4, %v1773_v16, %v1777_v13  ;;  %v896_v19 = vshrl.u32 %v4549_v35, 16  ;;  %v899_v45 = vshll.u32 %v4549_v35, 16  ;;  %v4557_v6 = vld [vmem:[%s5823_s21 + $0xb8] sm:$0xf]  ;;  %v4554_v60 = vld [vmem:[%s5823_s21 + $0xac] sm:$0x1] }
  0x3c   : > { %v4657_v37 = vcombine.low %v1778_v27, %v1792_v28  ;;  %v1806_v42 = vsel %vm5868_vm4, %v1801_v5, %v1805_v30  ;;  %v913_v47 = vshll.u32 %v4551_v38, 16  ;;  %v924_v48 = vshrl.u32 %v4553_v39, 16  ;;  %v6039_v13 = vld [vmem:[%s6684_s1 + $0xc] sm:$0x3]  ;;  %v4556_v20 = vld [vmem:[%s5823_s21 + $0xb4] sm:$0x1] }
  0x3d   : > { %5090 = vmatmul.mubr.msk.bf16.gmra.mrb[4].mxu0 %vm212_vm1, %v5933_v2  ;;  %v5733_v2 = vld [vmem:[%s5823_s21 + $0xa0] ss:$8 sps:$4 sm:$0xff]   ;;  %v1815_v31 = vrot.slane %v1814_v21, 4  ;;  %v927_v49 = vshll.u32 %v4553_v39, 16  ;;  %v884_v54 = vrot.slane %v882_v40, 4  ;;  %v887_v55 = vrot.slane %v885_v41, 5 }
  0x3e   : > { %5095 = vmatprep.mubr.msk.bf16.mxu0 %vm212_vm1, %v5732_v46  ;;  %v910_v46 = vshrl.u32 %v4551_v38, 16  ;;  %v898_v57 = vrot.slane %v896_v19, 4  ;;  %v901_v58 = vrot.slane %v899_v45, 5  ;;  %v938_v61 = vshrl.u32 %v4555_v50, 16  ;;  %6698 = vst [vmem:[#allocation2_spill] sm:$0xff] %v6039_v13 }
  0x3f   : > { %5170 = vmatmul.mubr.msk.bf16.gmra.mrb[4].mxu1 %vm212_vm1, %v5857_v12  ;;  %v5995_v12 = vsel %vm225_vm0, %v5949_v23, 0  ;;  %v1820_v43 = vsel %vm5868_vm4, %v1815_v31, %v1819_v32  ;;  %v941_v62 = vshll.u32 %v4555_v50, 16  ;;  %v915_v0 = vrot.slane %v913_v47, 5  ;;  %v4558_v21 = vld [vmem:[%s5823_s21 + $0xbc] sm:$0x1] }
  0x40   : > { %5175 = vmatprep.mubr.msk.bf16.mxu1 %vm212_vm1, %v4655_v7  ;;  %v4658_v53 = vcombine.low %v1806_v42, %v1820_v43  ;;  %v912_v63 = vrot.slane %v910_v46, 4  ;;  %v926_v7 = vrot.slane %v924_v48, 4  ;;  %v929_v9 = vrot.slane %v927_v49, 5  ;;  %v6045_v24 = vld [vmem:[%s5823_s21 + $0xe8] ss:$8 sps:$4 sm:$0xff]  }
  0x41   : > { %v905_v10 = vshll.u32 %v4550_v52, 16  ;;  %v952_v11 = vshrl.u32 %v4557_v6, 16  ;;  %v955_v14 = vshll.u32 %v4557_v6, 16  ;;  %v888_v15 = vor.u32 %v887_v55, %v884_v54  ;;  %v6058_v5 = vld [vmem:[%s5823_s21 + $0xf8] ss:$8 sps:$4 sm:$0xff]  }
  0x42   : > { %v919_v16 = vshll.u32 %v4552_v56, 16  ;;  %v933_v17 = vshll.u32 %v4554_v60, 16  ;;  %v902_v18 = vor.u32 %v901_v58, %v898_v57  ;;  %v940_v22 = vrot.slane %v938_v61, 4  ;;  %v4561_v40 = vld [vmem:[%s5823_s21 + $0xc8] sm:$0xf] }
  0x43   : > { %v6049_v25 = vsel %vm225_vm0, %v6000_v29, 0  ;;  %v930_v27 = vor.u32 %v929_v9, %v926_v7  ;;  %v6053_v28 = vsel %vm225_vm0, %v6039_v13, 0  ;;  %v907_v31 = vrot.slane %v905_v10, 5  ;;  %v4560_v19 = vld [vmem:[%s5823_s21 + $0xc4] sm:$0x1] }
  0x44   : > { %6699 = vst [vmem:[#allocation3_spill] sm:$0xff] %v6049_v25  ;;  %6700 = vst [vmem:[#allocation4_spill] sm:$0xff] %v6053_v28  ;;  %v954_v32 = vrot.slane %v952_v11, 4  ;;  %v957_v33 = vrot.slane %v955_v14, 5  ;;  %v889_v35 = vrot.slane %v888_v15, 4  ;;  %v947_v38 = vshll.u32 %v4556_v20, 16 }
  0x45   : > { %5096 = vmatmul.mubr.msk.bf16.vlgmr.msra.gmra.mrb[0].mxu0 %vm212_vm1, %v5733_v2  ;;  %v943_v2 = vrot.slane %v941_v62, 5  ;;  %v961_v39 = vshll.u32 %v4558_v21, 16  ;;  %v903_v41 = vrot.slane %v902_v18, 4  ;;  %v6064_v42 = vrot.slane %v933_v17, 5  ;;  %v4671_v45 = vld [vmem:[%s5823_s21 + $0xd8] sm:$0xf] }
  0x46   : > { %5099 = vmatprep.mubr.msk.bf16.mxu0 %vm212_vm1, %v5734_v26  ;;  %5104 = vmatpush3.bf16.msra.mxu0 %v5995_v12  ;;  %v916_v26 = vor.u32 %v915_v0, %v912_v63  ;;  %v931_v47 = vrot.slane %v930_v27, 4  ;;  %v4673_v50 = vld [vmem:[%s5823_s21 + $0xe0] sm:$0xf]  ;;  %v980_v52 = vshrl.u32 %v4561_v40, 16  ;;  %v949_v54 = vrot.slane %v947_v38, 5 }
  0x47   : > { %5684 = vmatprep.subr.msk.bf16.mxu0 %vm225_vm0, %v6000_v29  ;;  %5176 = vmatmul.mubr.msk.bf16.vlgmr.msra.gmra.mrb[0].mxu1 %vm212_vm1, %v4656_v34  ;;  %v4559_v34 = vld [vmem:[%s5823_s21 + $0xc0] sm:$0xf]  ;;  %v944_v43 = vor.u32 %v943_v2, %v940_v22  ;;  %v963_v55 = vrot.slane %v961_v39, 5  ;;  %v4562_v56 = vld [vmem:[%s5823_s21 + $0xcc] sm:$0x1]  ;;  %v2081_v6 = vshrl.u32 %v4671_v45, 16  ;;  %v908_v60 = vsel %vm5868_vm4, %v903_v41, %v907_v31 }
  0x48   : > { %5184 = vmatpush3.bf16.msra.mxu1 %v5944_v59  ;;  %5179 = vmatprep.mubr.msk.bf16.mxu1 %vm212_vm1, %v4657_v37  ;;  %v6061_v37 = vrot.slane %v919_v16, 5  ;;  %v917_v46 = vrot.slane %v916_v26, 4  ;;  %v966_v48 = vshrl.u32 %v4559_v34, 16  ;;  %v969_v49 = vshll.u32 %v4559_v34, 16  ;;  %v4672_v15 = vld [vmem:[%s5823_s21 + $0xdc] sm:$0x1] }
  0x49   : > { %5692 = vmatprep.subr.msk.bf16.mxu1 %vm225_vm0, %v5949_v23  ;;  %v891_v23 = vshll.u32 %v4548_v51, 16  ;;  %v958_v51 = vor.u32 %v957_v33, %v954_v32  ;;  %v2084_v57 = vshll.u32 %v4671_v45, 16  ;;  %v945_v61 = vrot.slane %v944_v43, 4  ;;  %v6088_v16 = vld [vmem:[%s5823_s21 + $0x108] ss:$8 sps:$4 sm:$0xff]  }
  0x4a   : > { %v975_v62 = vshll.u32 %v4560_v19, 16  ;;  %v968_v63 = vrot.slane %v966_v48, 4  ;;  %v971_v0 = vrot.slane %v969_v49, 5  ;;  %v2095_v7 = vshrl.u32 %v4673_v50, 16  ;;  %v4674_v18 = vld [vmem:[%s5823_s21 + $0xe4] sm:$0x1] }
  0x4b   : > { %v893_v30 = vrot.slane %v891_v23, 5  ;;  %v2098_v9 = vshll.u32 %v4673_v50, 16  ;;  %v959_v23 = vrot.slane %v958_v51, 4  ;;  %v982_v10 = vrot.slane %v980_v52, 4  ;;  %v4676_v31 = vld [vmem:[%s5823_s21 + $0xec] sm:$0x1] }
  0x4c   : > { %v989_v14 = vshll.u32 %v4562_v56, 16  ;;  %v2083_v20 = vrot.slane %v2081_v6, 4  ;;  %v2086_v21 = vrot.slane %v2084_v57, 5  ;;  %v922_v22 = vsel %vm5868_vm4, %v917_v46, %v6061_v37  ;;  %v4679_v45 = vld [vmem:[%s5823_s21 + $0xf8] sm:$0xf] }
  0x4d   : > { %5100 = vmatmul.mubr.msk.bf16.gmra.mrb[4].mxu0 %vm212_vm1, %v6016_v44  ;;  %v894_v58 = vsel %vm5868_vm4, %v889_v35, %v893_v30  ;;  %v936_v2 = vsel %vm5868_vm4, %v931_v47, %v6064_v42  ;;  %v950_v26 = vsel %vm5868_vm4, %v945_v61, %v949_v54  ;;  %v6103_v27 = vrot.slane %v975_v62, 5  ;;  %v4675_v30 = vld [vmem:[%s5823_s21 + $0xe8] sm:$0xf]  ;;  %v4677_v35 = vld [vmem:[%s5823_s21 + $0xf0] sm:$0xf] }
  0x4e   : > { %5105 = vmatprep.mubr.msk.bf16.mxu0 %vm212_vm1, %v6023_v4  ;;  %v6090_v17 = vcombine.low %v894_v58, %v908_v60  ;;  %v2090_v32 = vshll.u32 %v4672_v15, 16  ;;  %v2097_v33 = vrot.slane %v2095_v7, 4  ;;  %v2100_v34 = vrot.slane %v2098_v9, 5  ;;  %v4681_v49 = vld [vmem:[%s5823_s21 + $0x100] sm:$0xf] }
  0x4f   : > { %5180 = vmatmul.mubr.msk.bf16.gmra.mrb[4].mxu1 %vm212_vm1, %v4658_v53  ;;  %v983_v53 = vshll.u32 %v4561_v40, 16  ;;  %v964_v37 = vsel %vm5868_vm4, %v959_v23, %v963_v55  ;;  %v991_v39 = vrot.slane %v989_v14, 5  ;;  %v2104_v40 = vshll.u32 %v4674_v18, 16  ;;  %v4678_v56 = vld [vmem:[%s5823_s21 + $0xf4] sm:$0x1] }
  0x50   : > { %5185 = vmatprep.mubr.msk.bf16.mxu1 %vm212_vm1, %v6023_v4  ;;  %v2087_v41 = vor.u32 %v2086_v21, %v2083_v20  ;;  %v2109_v42 = vshrl.u32 %v4675_v30, 16  ;;  %v2112_v43 = vshll.u32 %v4675_v30, 16  ;;  %v2118_v19 = vshll.u32 %v4676_v31, 16  ;;  %v6128_v58 = vld [vmem:[%s6684_s1 + $0xe] sm:$0x3] }
  0x51   : > { %v985_v11 = vrot.slane %v983_v53, 5  ;;  %v6115_v46 = vcombine.low %v922_v22, %v936_v2  ;;  %v2123_v47 = vshrl.u32 %v4677_v35, 16  ;;  %v2126_v48 = vshll.u32 %v4677_v35, 16  ;;  %6701 = vst [vmem:[#allocation5_spill] sm:$0xff] %v6128_v58  ;;  %v4680_v14 = vld [vmem:[%s5823_s21 + $0xfc] sm:$0x1] }
  0x52   : > { %v6120_v50 = vcombine.low %v950_v26, %v964_v37  ;;  %v2092_v52 = vrot.slane %v2090_v32, 5  ;;  %v2101_v53 = vor.u32 %v2100_v34, %v2097_v33  ;;  %v2106_v55 = vrot.slane %v2104_v40, 5  ;;  %v4683_v15 = vld [vmem:[%s5823_s21 + $0x108] sm:$0xf]  ;;  %v4685_v21 = vld [vmem:[%s5823_s21 + $0x110] sm:$0xf] }
  0x53   : > { %v986_v38 = vor.u32 %v985_v11, %v982_v10  ;;  %v2137_v6 = vshrl.u32 %v4679_v45, 16  ;;  %v2140_v57 = vshll.u32 %v4679_v45, 16  ;;  %v2088_v60 = vrot.slane %v2087_v41, 4  ;;  %v6148_v32 = vld [vmem:[%s5823_s21 + $0x8] ss:$8 sps:$4 sm:$0xff]  }
  0x54   : > { %v2111_v61 = vrot.slane %v2109_v42, 4  ;;  %v2151_v62 = vshrl.u32 %v4681_v49, 16  ;;  %v6130_v7 = vrot.slane %v2118_v19, 5  ;;  %v2125_v9 = vrot.slane %v2123_v47, 4  ;;  %v4682_v33 = vld [vmem:[%s5823_s21 + $0x104] sm:$0x1] }
  0x55   : > { %5106 = vmatmul.mubr.msk.bf16.vlgmr.msra.gmra.mrb[0].mxu0 %vm212_vm1, %v6045_v24  ;;  %v987_v54 = vrot.slane %v986_v38, 4  ;;  %v2128_v23 = vrot.slane %v2126_v48, 5  ;;  %v2102_v10 = vrot.slane %v2101_v53, 4  ;;  %v2132_v11 = vshll.u32 %v4678_v56, 16 }
  0x56   : > { %5109 = vmatprep.mubr.msk.bf16.mxu0 %vm212_vm1, %v6058_v5  ;;  %5114 = vmatpush3.bf16.msra.mxu0 %v6049_v25  ;;  %v2139_v18 = vrot.slane %v2137_v6, 4  ;;  %v2142_v20 = vrot.slane %v2140_v57, 5  ;;  %v2153_v26 = vrot.slane %v2151_v62, 4  ;;  %v2165_v34 = vshrl.u32 %v4683_v15, 16 }
  0x57   : > { %5685 = vmatprep.subr.msk.bf16.mxu0 %vm225_vm0, %v6039_v13  ;;  %5186 = vmatmul.mubr.msk.bf16.vlgmr.msra.gmra.mrb[0].mxu1 %vm212_vm1, %v6045_v24  ;;  %v992_v2 = vsel %vm5868_vm4, %v987_v54, %v991_v39  ;;  %v2168_v35 = vshll.u32 %v4683_v15, 16  ;;  %v2179_v37 = vshrl.u32 %v4685_v21, 16  ;;  %v2093_v39 = vsel %vm5868_vm4, %v2088_v60, %v2092_v52  ;;  %v4684_v52 = vld [vmem:[%s5823_s21 + $0x10c] sm:$0x1]  ;;  %v6186_v15 = vld [vmem:[%s5823_s21 + $0x28] ss:$8 sps:$4 sm:$0xff]  }
  0x58   : > { %5194 = vmatpush3.bf16.msra.mxu1 %v5995_v12  ;;  %5189 = vmatprep.mubr.msk.bf16.mxu1 %vm212_vm1, %v6058_v5  ;;  %v2134_v40 = vrot.slane %v2132_v11, 5  ;;  %v2146_v41 = vshll.u32 %v4680_v14, 16  ;;  %v2107_v42 = vsel %vm5868_vm4, %v2102_v10, %v2106_v55  ;;  %v2160_v45 = vshll.u32 %v4682_v33, 16  ;;  %v4686_v55 = vld [vmem:[%s5823_s21 + $0x114] sm:$0x1] }
  0x59   : > { %5693 = vmatprep.subr.msk.bf16.mxu1 %vm225_vm0, %v6000_v29  ;;  %v972_v29 = vor.u32 %v971_v0, %v968_v63  ;;  %v2154_v63 = vshll.u32 %v4681_v49, 16  ;;  %v2114_v0 = vrot.slane %v2112_v43, 5  ;;  %v2143_v43 = vor.u32 %v2142_v20, %v2139_v18  ;;  %v4606_v14 = vld [vmem:[%s5823_s21 + $0x8] sm:$0xf]  ;;  %v4608_v18 = vld [vmem:[%s5823_s21 + $0x10] sm:$0xf] }
  0x5a   : > { %v2167_v49 = vrot.slane %v2165_v34, 4  ;;  %v2181_v53 = vrot.slane %v2179_v37, 4  ;;  %v6167_v56 = vcombine.low %v2093_v39, %v2107_v42  ;;  %v2148_v57 = vrot.slane %v2146_v41, 5  ;;  %v6212_v39 = vld [vmem:[%s5823_s21 + $0x38] ss:$8 sps:$4 sm:$0xff]  }
  0x5b   : > { %v973_v51 = vrot.slane %v972_v29, 4  ;;  %v2156_v30 = vrot.slane %v2154_v63, 5  ;;  %v2115_v31 = vor.u32 %v2114_v0, %v2111_v61  ;;  %v2129_v29 = vor.u32 %v2128_v23, %v2125_v9  ;;  %v6180_v23 = vld [vmem:[%s5823_s21 + $0x18] ss:$8 sps:$4 sm:$0xff]  }
  0x5c   : > { %v2144_v6 = vrot.slane %v2143_v43, 4  ;;  %v2162_v61 = vrot.slane %v2160_v45, 5  ;;  %v2174_v9 = vshll.u32 %v4684_v52, 16  ;;  %v2188_v11 = vshll.u32 %v4686_v55, 16  ;;  %v4610_v43 = vld [vmem:[%s5823_s21 + $0x18] sm:$0xf] }
  0x5d   : > { %5110 = vmatmul.mubr.msk.bf16.gmra.mrb[4].mxu0 %vm212_vm1, %v6088_v16  ;;  %v978_v22 = vsel %vm5868_vm4, %v973_v51, %v6103_v27  ;;  %v2182_v27 = vshll.u32 %v4685_v21, 16  ;;  %v2157_v19 = vor.u32 %v2156_v30, %v2153_v26  ;;  %v2116_v47 = vrot.slane %v2115_v31, 4  ;;  %v6202_v30 = vld [vmem:[%s6684_s1 + $0x10] sm:$0x3]  ;;  %v4612_v52 = vld [vmem:[%s5823_s21 + $0x20] sm:$0xf] }
  0x5e   : > { %5115 = vmatprep.mubr.msk.bf16.mxu0 %vm212_vm1, %v6090_v17  ;;  %v6156_v38 = vcombine.low %v978_v22, %v992_v2  ;;  %v2130_v48 = vrot.slane %v2129_v29, 4  ;;  %v2170_v51 = vrot.slane %v2168_v35, 5  ;;  %v2149_v20 = vsel %vm5868_vm4, %v2144_v6, %v2148_v57  ;;  %v4614_v57 = vld [vmem:[%s5823_s21 + $0x28] sm:$0xf] }
  0x5f   : > { %5190 = vmatmul.mubr.msk.bf16.gmra.mrb[4].mxu1 %vm212_vm1, %v6088_v16  ;;  %v2184_v54 = vrot.slane %v2182_v27, 5  ;;  %v2158_v60 = vrot.slane %v2157_v19, 4  ;;  %v2121_v62 = vsel %vm5868_vm4, %v2116_v47, %v6130_v7  ;;  %v6197_v22 = vsel %vm225_vm0, %v6128_v58, 0  ;;  %v4609_v47 = vld [vmem:[%s5823_s21 + $0x14] sm:$0x1] }
  0x60   : > { %5195 = vmatprep.mubr.msk.bf16.mxu1 %vm212_vm1, %v6090_v17  ;;  %v2135_v63 = vsel %vm5868_vm4, %v2130_v48, %v2134_v40  ;;  %v2171_v0 = vor.u32 %v2170_v51, %v2167_v49  ;;  %6702 = vst [vmem:[#allocation6_spill] sm:$0xff] %v6197_v22  ;;  %v2176_v26 = vrot.slane %v2174_v9, 5  ;;  %v1350_v31 = vshrl.u32 %v4606_v14, 16  ;;  %v4607_v40 = vld [vmem:[%s5823_s21 + $0xc] sm:$0x1] }
  0x61   : > { %v2185_v10 = vor.u32 %v2184_v54, %v2181_v53  ;;  %v6189_v7 = vcombine.low %v2121_v62, %v2135_v63  ;;  %v2163_v21 = vsel %vm5868_vm4, %v2158_v60, %v2162_v61  ;;  %v1353_v29 = vshll.u32 %v4606_v14, 16  ;;  %v4611_v51 = vld [vmem:[%s5823_s21 + $0x1c] sm:$0x1]  ;;  %v4613_v53 = vld [vmem:[%s5823_s21 + $0x24] sm:$0x1] }
  0x62   : > { %v2172_v2 = vrot.slane %v2171_v0, 4  ;;  %v2190_v34 = vrot.slane %v2188_v11, 5  ;;  %v1364_v35 = vshrl.u32 %v4608_v18, 16  ;;  %v1367_v37 = vshll.u32 %v4608_v18, 16  ;;  %v6237_v61 = vld [vmem:[%s5823_s21 + $0x50] ss:$8 sps:$4 sm:$0xff]  }
  0x63   : > { %v2186_v33 = vrot.slane %v2185_v10, 4  ;;  %v6206_v27 = vcombine.low %v2149_v20, %v2163_v21  ;;  %v1352_v41 = vrot.slane %v1350_v31, 4  ;;  %v1355_v42 = vrot.slane %v1353_v29, 5  ;;  %v4616_v9 = vld [vmem:[%s5823_s21 + $0x30] sm:$0xf] }
  0x64   : > { %v2177_v19 = vsel %vm5868_vm4, %v2172_v2, %v2176_v26  ;;  %v1366_v48 = vrot.slane %v1364_v35, 4  ;;  %v1369_v49 = vrot.slane %v1367_v37, 5  ;;  %v1359_v54 = vshll.u32 %v4607_v40, 16 }
  0x65   : > { %5116 = vmatmul.mubr.msk.bf16.vlgmr.msra.gmra.mrb[0].mxu0 %vm212_vm1, %v6115_v46  ;;  %v2191_v45 = vsel %vm5868_vm4, %v2186_v33, %v2190_v34  ;;  %v1378_v55 = vshrl.u32 %v4610_v43, 16  ;;  %v1381_v6 = vshll.u32 %v4610_v43, 16  ;;  %v1356_v62 = vor.u32 %v1355_v42, %v1352_v41  ;;  %v4618_v34 = vld [vmem:[%s5823_s21 + $0x38] sm:$0xf]  ;;  %v4615_v42 = vld [vmem:[%s5823_s21 + $0x2c] sm:$0x1] }
  0x66   : > { %5119 = vmatprep.mubr.msk.bf16.mxu0 %vm212_vm1, %v6120_v50  ;;  %5124 = vmatpush3.bf16.msra.mxu0 %v6053_v28  ;;  %v6234_v60 = vcombine.low %v2177_v19, %v2191_v45  ;;  %v1373_v63 = vshll.u32 %v4609_v47, 16  ;;  %v1387_v0 = vshll.u32 %v4611_v51, 16  ;;  %v1370_v10 = vor.u32 %v1369_v49, %v1366_v48  ;;  %v6261_v43 = vld [vmem:[%s5823_s21 + $0x60] ss:$8 sps:$4 sm:$0xff]   ;;  %v6269_v51 = vld [vmem:[%s5823_s21 + $0x70] ss:$8 sps:$4 sm:$0xff]  }
  0x67   : > { %5686 = vmatprep.subr.msk.bf16.mxu0 %vm225_vm0, %v6128_v58  ;;  %5196 = vmatmul.mubr.msk.bf16.vlgmr.msra.gmra.mrb[0].mxu1 %vm212_vm1, %v6115_v46  ;;  %v1392_v11 = vshrl.u32 %v4612_v52, 16  ;;  %v1395_v14 = vshll.u32 %v4612_v52, 16  ;;  %v1401_v18 = vshll.u32 %v4613_v53, 16  ;;  %v6246_v20 = vsel %vm225_vm0, %v6202_v30, 0  ;;  %v4620_v49 = vld [vmem:[%s5823_s21 + $0x40] sm:$0xf] }
  0x68   : > { %5204 = vmatpush3.bf16.msra.mxu1 %v6049_v25  ;;  %5199 = vmatprep.mubr.msk.bf16.mxu1 %vm212_vm1, %v6120_v50  ;;  %v1406_v21 = vshrl.u32 %v4614_v57, 16  ;;  %v1409_v2 = vshll.u32 %v4614_v57, 16  ;;  %v1380_v26 = vrot.slane %v1378_v55, 4  ;;  %v1383_v31 = vrot.slane %v1381_v6, 5  ;;  %v4617_v57 = vld [vmem:[%s5823_s21 + $0x34] sm:$0x1] }
  0x69   : > { %5694 = vmatprep.subr.msk.bf16.mxu1 %vm225_vm0, %v6039_v13  ;;  %v1420_v29 = vshrl.u32 %v4616_v9, 16  ;;  %v1423_v33 = vshll.u32 %v4616_v9, 16  ;;  %v6249_v35 = vrot.slane %v1356_v62, 4  ;;  %v6251_v37 = vrot.slane %v1359_v54, 5  ;;  %v4619_v9 = vld [vmem:[%s5823_s21 + $0x3c] sm:$0x1] }
  0x6a   : > { %v6253_v40 = vrot.slane %v1373_v63, 5  ;;  %v6255_v41 = vrot.slane %v1387_v0, 5  ;;  %v1371_v19 = vrot.slane %v1370_v10, 4  ;;  %v1394_v45 = vrot.slane %v1392_v11, 4  ;;  %v4621_v10 = vld [vmem:[%s5823_s21 + $0x44] sm:$0x1] }
  0x6b   : > { %v1397_v47 = vrot.slane %v1395_v14, 5  ;;  %v6263_v48 = vrot.slane %v1401_v18, 5  ;;  %v1408_v52 = vrot.slane %v1406_v21, 4  ;;  %v1411_v53 = vrot.slane %v1409_v2, 5  ;;  %v4703_v21 = vld [vmem:[%s5823_s21 + $0x50] sm:$0xf] }
  0x6c   : > { %v1434_v54 = vshrl.u32 %v4618_v34, 16  ;;  %v1437_v55 = vshll.u32 %v4618_v34, 16  ;;  %v1384_v6 = vor.u32 %v1383_v31, %v1380_v26  ;;  %v1415_v62 = vshll.u32 %v4615_v42, 16  ;;  %v4709_v25 = vld [vmem:[%s5823_s21 + $0x68] sm:$0xf] }
  0x6d   : > { %5120 = vmatmul.mubr.msk.bf16.gmra.mrb[4].mxu0 %vm212_vm1, %v6156_v38  ;;  %v1422_v63 = vrot.slane %v1420_v29, 4  ;;  %v1425_v0 = vrot.slane %v1423_v33, 5  ;;  %v1448_v11 = vshrl.u32 %v4620_v49, 16  ;;  %v1451_v14 = vshll.u32 %v4620_v49, 16  ;;  %v4705_v33 = vld [vmem:[%s5823_s21 + $0x58] sm:$0xf] }
  0x6e   : > { %5125 = vmatprep.mubr.msk.bf16.mxu0 %vm212_vm1, %v6148_v32  ;;  %v1362_v18 = vsel %vm5868_vm4, %v6249_v35, %v6251_v37  ;;  %v1398_v2 = vor.u32 %v1397_v47, %v1394_v45  ;;  %v1412_v26 = vor.u32 %v1411_v53, %v1408_v52  ;;  %v1436_v31 = vrot.slane %v1434_v54, 4  ;;  %v6291_v35 = vld [vmem:[%s6684_s1 + $0x2] sm:$0x3] }
  0x6f   : > { %5200 = vmatmul.mubr.msk.bf16.gmra.mrb[4].mxu1 %vm212_vm1, %v6156_v38  ;;  %v1439_v29 = vrot.slane %v1437_v55, 5  ;;  %v1376_v34 = vsel %vm5868_vm4, %v1371_v19, %v6253_v40  ;;  %v1385_v42 = vrot.slane %v1384_v6, 4  ;;  %v1426_v49 = vor.u32 %v1425_v0, %v1422_v63  ;;  %v6298_v40 = vld [vmem:[%s5823_s21 + $0x80] ss:$8 sps:$4 sm:$0xff]  }
  0x70   : > { %5205 = vmatprep.mubr.msk.bf16.mxu1 %vm212_vm1, %v6167_v56  ;;  %v1450_v37 = vrot.slane %v1448_v11, 4  ;;  %v1453_v45 = vrot.slane %v1451_v14, 5  ;;  %v2452_v47 = vshrl.u32 %v4703_v21, 16  ;;  %v2455_v52 = vshll.u32 %v4703_v21, 16  ;;  %v4704_v11 = vld [vmem:[%s5823_s21 + $0x54] sm:$0x1] }
  0x71   : > { %v1443_v19 = vshll.u32 %v4619_v9, 16  ;;  %v1457_v53 = vshll.u32 %v4621_v10, 16  ;;  %v2466_v54 = vshrl.u32 %v4705_v33, 16  ;;  %v2469_v55 = vshll.u32 %v4705_v33, 16  ;;  %v4706_v9 = vld [vmem:[%s5823_s21 + $0x5c] sm:$0x1] }
  0x72   : > { %v1399_v6 = vrot.slane %v1398_v2, 4  ;;  %v1417_v63 = vrot.slane %v1415_v62, 5  ;;  %v1440_v0 = vor.u32 %v1439_v29, %v1436_v31  ;;  %v1427_v14 = vrot.slane %v1426_v49, 4  ;;  %v4707_v10 = vld [vmem:[%s5823_s21 + $0x60] sm:$0xf] }
  0x73   : > { %v6308_v33 = vcombine.low %v1362_v18, %v1376_v34  ;;  %v2457_v13 = vrot.slane %v2455_v52, 5  ;;  %v1445_v62 = vrot.slane %v1443_v19, 5  ;;  %v1459_v2 = vrot.slane %v1457_v53, 5  ;;  %v4711_v49 = vld [vmem:[%s5823_s21 + $0x70] sm:$0xf] }
  0x74   : > { %v2471_v31 = vrot.slane %v2469_v55, 5  ;;  %v2461_v29 = vshll.u32 %v4704_v11, 16  ;;  %v1390_v18 = vsel %vm5868_vm4, %v1385_v42, %v6255_v41  ;;  %v1404_v34 = vsel %vm5868_vm4, %v1399_v6, %v6263_v48 }
  0x75   : > { %5126 = vmatmul.mubr.msk.bf16.vlgmr.msra.gmra.mrb[0].mxu0 %vm212_vm1, %v6180_v23  ;;  %v2475_v53 = vshll.u32 %v4706_v9, 16  ;;  %v2483_v41 = vshll.u32 %v4707_v10, 16  ;;  %v2494_v42 = vshrl.u32 %v4709_v25, 16  ;;  %v6331_v48 = vcombine.low %v1390_v18, %v1404_v34 }
  0x76   : > { %5129 = vmatprep.mubr.msk.bf16.mxu0 %vm212_vm1, %v6186_v15  ;;  %5134 = vmatpush3.bf16.msra.mxu0 %v6197_v22 }
  0x77   : > { %5687 = vmatprep.subr.msk.bf16.mxu0 %vm225_vm0, %v6202_v30  ;;  %5206 = vmatmul.mubr.msk.bf16.vlgmr.msra.gmra.mrb[0].mxu1 %vm212_vm1, %v6189_v7 }
  0x78   : > { %5214 = vmatpush3.bf16.msra.mxu1 %v6053_v28  ;;  %5209 = vmatprep.mubr.msk.bf16.mxu1 %vm212_vm1, %v6206_v27  ;;  %v2454_v28 = vrot.slane %v2452_v47, 4  ;;  %v4713_v47 = vld [vmem:[%s5823_s21 + $0x78] sm:$0xf] }
  0x79   : > { %5695 = vmatprep.subr.msk.bf16.mxu1 %vm225_vm0, %v6128_v58  ;;  %v1429_v58 = vshll.u32 %v4617_v57, 16  ;;  %v1413_v57 = vrot.slane %v1412_v26, 4  ;;  %v2468_v26 = vrot.slane %v2466_v54, 4  ;;  %v2480_v54 = vshrl.u32 %v4707_v10, 16 }
  0x7a   : > { %v2458_v19 = vor.u32 %v2457_v13, %v2454_v28  ;;  %v2463_v28 = vrot.slane %v2461_v29, 5  ;;  %v2525_v11 = vshll.u32 %v4713_v47, 16  ;;  %v4715_v29 = vld [vmem:[%s5823_s21 + $0x80] sm:$0xf] }
  0x7b   : > { %v1431_v21 = vrot.slane %v1429_v58, 5  ;;  %v1441_v58 = vrot.slane %v1440_v0, 4  ;;  %v2472_v55 = vor.u32 %v2471_v31, %v2468_v26  ;;  %v2497_v0 = vshll.u32 %v4709_v25, 16  ;;  %v4708_v26 = vld [vmem:[%s5823_s21 + $0x64] sm:$0x1] }
  0x7c   : > { %v2482_v9 = vrot.slane %v2480_v54, 4  ;;  %v2496_v31 = vrot.slane %v2494_v42, 4  ;;  %v4712_v54 = vld [vmem:[%s5823_s21 + $0x74] sm:$0x1] }
  0x7d   : > { %5130 = vmatmul.mubr.msk.bf16.gmra.mrb[4].mxu0 %vm212_vm1, %v6212_v39  ;;  %v1446_v13 = vsel %vm5868_vm4, %v1441_v58, %v1445_v62  ;;  %v2473_v10 = vrot.slane %v2472_v55, 4  ;;  %v2485_v62 = vrot.slane %v2483_v41, 5  ;;  %v2499_v58 = vrot.slane %v2497_v0, 5  ;;  %v4714_v55 = vld [vmem:[%s5823_s21 + $0x7c] sm:$0x1] }
  0x7e   : > { %5135 = vmatprep.mubr.msk.bf16.mxu0 %vm212_vm1, %v6237_v61 }
  0x7f   : > { %5210 = vmatmul.mubr.msk.bf16.gmra.mrb[4].mxu1 %vm212_vm1, %v6234_v60  ;;  %v2486_v42 = vor.u32 %v2485_v62, %v2482_v9  ;;  %v2500_v0 = vor.u32 %v2499_v58, %v2496_v31  ;;  %v4716_v58 = vld [vmem:[%s5823_s21 + $0x84] sm:$0x1] }
  0x80   : > { %5215 = vmatprep.mubr.msk.bf16.mxu1 %vm212_vm1, %v6237_v61 }
  0x81   : > { %v2501_v62 = vrot.slane %v2500_v0, 4 }
  0x85   : > { %5136 = vmatmul.mubr.msk.bf16.vlgmr.msra.gmra.mrb[0].mxu0 %vm212_vm1, %v6261_v43 }
  0x86   : > { %5139 = vmatprep.mubr.msk.bf16.mxu0 %vm212_vm1, %v6269_v51  ;;  %5144 = vmatpush3.bf16.msra.mxu0 %v6246_v20 }
  0x87   : > { %5697 = vmatprep.subr.msk.bf16.mxu0 %vm225_vm0, %v6291_v35  ;;  %5216 = vmatmul.mubr.msk.bf16.vlgmr.msra.gmra.mrb[0].mxu1 %vm212_vm1, %v6261_v43 }
  0x88   : > { %5224 = vmatpush3.bf16.msra.mxu1 %v6197_v22  ;;  %5219 = vmatprep.mubr.msk.bf16.mxu1 %vm212_vm1, %v6269_v51  ;;  %v1454_v22 = vor.u32 %v1453_v45, %v1450_v37  ;;  %v1418_v37 = vsel %vm5868_vm4, %v1413_v57, %v1417_v63  ;;  %v1432_v45 = vsel %vm5868_vm4, %v1427_v14, %v1431_v21  ;;  %v2511_v57 = vshll.u32 %v4711_v49, 16 }
  0x89   : > { %5696 = vmatprep.subr.msk.bf16.mxu1 %vm225_vm0, %v6202_v30  ;;  %v6333_v6 = vcombine.low %v1418_v37, %v1432_v45  ;;  %v2522_v63 = vshrl.u32 %v4713_v47, 16  ;;  %v2459_v14 = vrot.slane %v2458_v19, 4  ;;  %v2477_v21 = vrot.slane %v2475_v53, 5  ;;  %v4717_v45 = vld [vmem:[%s5823_s21 + $0x88] sm:$0xf] }
  0x8a   : > { %v1455_v52 = vrot.slane %v1454_v22, 4  ;;  %v2508_v22 = vshrl.u32 %v4711_v49, 16  ;;  %v2513_v18 = vrot.slane %v2511_v57, 5  ;;  %v2527_v37 = vrot.slane %v2525_v11, 5  ;;  %v6351_v47 = vld [vmem:[%s6684_s1] sm:$0x3] }
  0x8b   : > { %v2524_v34 = vrot.slane %v2522_v63, 4  ;;  %v2464_v19 = vsel %vm5868_vm4, %v2459_v14, %v2463_v28  ;;  %v2489_v53 = vshll.u32 %v4708_v26, 16  ;;  %v2478_v41 = vsel %vm5868_vm4, %v2473_v10, %v2477_v21 }
  0x8c   : > { %v1460_v25 = vsel %vm5868_vm4, %v1455_v52, %v1459_v2  ;;  %v4710_v2 = vld [vmem:[%s5823_s21 + $0x6c] sm:$0x1]  ;;  %v2510_v49 = vrot.slane %v2508_v22, 4  ;;  %v2539_v28 = vshll.u32 %v4715_v29, 16  ;;  %v2550_v57 = vshrl.u32 %v4717_v45, 16 }
  0x8d   : > { %5140 = vmatmul.mubr.msk.bf16.gmra.mrb[4].mxu0 %vm212_vm1, %v6298_v40  ;;  %v6355_v52 = vcombine.low %v1446_v13, %v1460_v25  ;;  %v2503_v22 = vshll.u32 %v4710_v2, 16  ;;  %v2536_v13 = vshrl.u32 %v4715_v29, 16  ;;  %v2553_v63 = vshll.u32 %v4717_v45, 16 }
  0x8e   : > { %5145 = vmatprep.mubr.msk.bf16.mxu0 %vm212_vm1, %v6308_v33  ;;  %v2514_v11 = vor.u32 %v2513_v18, %v2510_v49  ;;  %v2517_v25 = vshll.u32 %v4712_v54, 16  ;;  %v2528_v14 = vor.u32 %v2527_v37, %v2524_v34  ;;  %v2531_v21 = vshll.u32 %v4714_v55, 16 }
  0x8f   : > { %5220 = vmatmul.mubr.msk.bf16.gmra.mrb[4].mxu1 %vm212_vm1, %v6298_v40  ;;  %v2491_v9 = vrot.slane %v2489_v53, 5  ;;  %v6372_v10 = vcombine.low %v2464_v19, %v2478_v41  ;;  %v2487_v26 = vrot.slane %v2486_v42, 4  ;;  %v2505_v31 = vrot.slane %v2503_v22, 5  ;;  %v4718_v53 = vld [vmem:[%s5823_s21 + $0x8c] sm:$0x1] }
  0x90   : > { %5225 = vmatprep.mubr.msk.bf16.mxu1 %vm212_vm1, %v6308_v33  ;;  %v2538_v2 = vrot.slane %v2536_v13, 4  ;;  %v2552_v29 = vrot.slane %v2550_v57, 4  ;;  %v2555_v49 = vrot.slane %v2553_v63, 5  ;;  %v2515_v18 = vrot.slane %v2514_v11, 4 }
  0x91   : > { %v2519_v34 = vrot.slane %v2517_v25, 5  ;;  %v2529_v37 = vrot.slane %v2528_v14, 4  ;;  %v2533_v45 = vrot.slane %v2531_v21, 5  ;;  %v2492_v19 = vsel %vm5868_vm4, %v2487_v26, %v2491_v9  ;;  %v5758_v21 = vld [vmem:[%s6684_s1 + $0x4] sm:$0x3] }
  0x92   : > { %v2545_v54 = vshll.u32 %v4716_v58, 16  ;;  %v2506_v55 = vsel %vm5868_vm4, %v2501_v62, %v2505_v31  ;;  %v2556_v42 = vor.u32 %v2555_v49, %v2552_v29  ;;  %v2559_v0 = vshll.u32 %v4718_v53, 16  ;;  %v5759_v31 = vld [vmem:[%s5823_s21 + $0x90] ss:$8 sps:$4 sm:$0xff]   ;;  %v4793_v29 = vld [vmem:[%s5823_s21 + $0xc0] sm:$0xf] }
  0x93   : > { %v2520_v22 = vsel %vm5868_vm4, %v2515_v18, %v2519_v34  ;;  %v2534_v13 = vsel %vm5868_vm4, %v2529_v37, %v2533_v45  ;;  %v5761_v58 = vld [vmem:[%s5823_s21 + $0xb0] ss:$8 sps:$4 sm:$0xff]   ;;  %v4788_v45 = vld [vmem:[%s5823_s21 + $0xac] sm:$0x1] }
  0x94   : > { %v2547_v57 = vrot.slane %v2545_v54, 5  ;;  %v6394_v63 = vcombine.low %v2520_v22, %v2534_v13  ;;  %v2557_v25 = vrot.slane %v2556_v42, 4  ;;  %v2561_v14 = vrot.slane %v2559_v0, 5  ;;  %v4795_v0 = vld [vmem:[%s5823_s21 + $0xc8] sm:$0xf] }
  0x95   : > { %5146 = vmatmul.mubr.msk.bf16.vlgmr.msra.gmra.mrb[0].mxu0 %vm212_vm1, %v6331_v48  ;;  %v3408_v42 = vshll.u32 %v4793_v29, 16  ;;  %v4790_v22 = vld [vmem:[%s5823_s21 + $0xb4] sm:$0x1] }
  0x96   : > { %5149 = vmatprep.mubr.msk.bf16.mxu0 %vm212_vm1, %v6333_v6  ;;  %5244 = vmatpush3.bf16.msra.mxu0 %v5807_v1  ;;  %v2562_v26 = vsel %vm5868_vm4, %v2557_v25, %v2561_v14  ;;  %v3372_v14 = vshll.u32 %v4788_v45, 16 }
  0x97   : > { %5698 = vmatprep.subr.msk.bf16.mxu0 %vm225_vm0, %v6351_v47  ;;  %5226 = vmatmul.mubr.msk.bf16.vlgmr.msra.gmra.mrb[0].mxu1 %vm212_vm1, %v6331_v48 }
  0x98   : > { %5234 = vmatpush3.bf16.msra.mxu1 %v6246_v20  ;;  %5229 = vmatprep.mubr.msk.bf16.mxu1 %vm212_vm1, %v6333_v6 }
  0x99   : > { %5706 = vmatprep.subr.msk.bf16.mxu1 %vm225_vm0, %v6291_v35  ;;  %v2541_v35 = vrot.slane %v2539_v28, 5  ;;  %v6390_v28 = vcombine.low %v2492_v19, %v2506_v55 }
  0x9b   : > { %v2542_v41 = vor.u32 %v2541_v35, %v2538_v2 }
  0x9d   : > { %5150 = vmatmul.mubr.msk.bf16.gmra.mrb[4].mxu0 %vm212_vm1, %v6355_v52  ;;  %v2543_v11 = vrot.slane %v2542_v41, 4  ;;  %v3405_v41 = vshrl.u32 %v4793_v29, 16 }
  0x9e   : > { %5245 = vmatprep.mubr.msk.bf16.mxu0 %vm212_vm1, %v6023_v4 }
  0x9f   : > { %5230 = vmatmul.mubr.msk.bf16.gmra.mrb[4].mxu1 %vm212_vm1, %v6355_v52  ;;  %v2548_v9 = vsel %vm5868_vm4, %v2543_v11, %v2547_v57  ;;  %v5753_v57 = vld [vmem:[%s5823_s21 + $0xf0] ss:$8 sps:$4 sm:$0xff]  }
  0xa0   : > { %5235 = vmatprep.mubr.msk.bf16.mxu1 %vm212_vm1, %v6372_v10  ;;  %v6414_v62 = vcombine.low %v2548_v9, %v2562_v26  ;;  %v4792_v9 = vld [vmem:[%s5823_s21 + $0xbc] sm:$0x1] }
  0xa5   : > { %5246 = vmatmul.mubr.msk.bf16.vlgmr.msra.gmra.mrb[8].mxu0 %vm212_vm1, %v6045_v24 }
  0xa6   : > { %5249 = vmatprep.mubr.msk.bf16.mxu0 %vm212_vm1, %v6058_v5  ;;  %5254 = vmatpush3.bf16.msra.mxu0 %v5826_v3 }
  0xa7   : > { %5699 = vmatprep.subr.msk.bf16.mxu0 %vm225_vm0, %v5758_v21  ;;  %5236 = vmatmul.mubr.msk.bf16.vlgmr.msra.gmra.mrb[0].mxu1 %vm212_vm1, %v6390_v28 }
  0xa8   : > { %5334 = vmatpush3.bf16.msra.mxu1 %v5807_v1  ;;  %5239 = vmatprep.mubr.msk.bf16.mxu1 %vm212_vm1, %v6394_v63  ;;  %v5760_v1 = vld [vmem:[%s5823_s21 + $0xa0] ss:$8 sps:$4 sm:$0xff]  }
  0xa9   : > { %5707 = vmatprep.subr.msk.bf16.mxu1 %vm225_vm0, %v6351_v47  ;;  %v5762_v47 = vld [vmem:[%s6684_s1 + $0x6] sm:$0x3] }
  0xad   : > { %5250 = vmatmul.mubr.msk.bf16.gmra.mrb[12].mxu0 %vm212_vm1, %v6088_v16 }
  0xae   : > { %5255 = vmatprep.mubr.msk.bf16.mxu0 %vm212_vm1, %v5759_v31 }
  0xaf   : > { %5240 = vmatmul.mubr.msk.bf16.gmra.mrb[4].mxu1 %vm212_vm1, %v6414_v62 }
  0xb0   : > { %5335 = vmatprep.mubr.msk.bf16.mxu1 %vm212_vm1, %v6090_v17 }
  0xb5   : > { %5256 = vmatmul.mubr.msk.bf16.vlgmr.msra.gmra.mrb[8].mxu0 %vm212_vm1, %v5760_v1  ;;  %v3419_v1 = vshrl.u32 %v4795_v0, 16 }
  0xb6   : > { %5259 = vmatprep.mubr.msk.bf16.mxu0 %vm212_vm1, %v5761_v58  ;;  %5264 = vmatpush3.bf16.msra.mxu0 %v5848_v8  ;;  %v3422_v58 = vshll.u32 %v4795_v0, 16  ;;  %v4843_v0 = vld [vmem:[%s5823_s21 + $0xf0] sm:$0xf] }
  0xb7   : > { %5700 = vmatprep.subr.msk.bf16.mxu0 %vm225_vm0, %v5762_v47  ;;  %5336 = vmatmul.mubr.msk.bf16.vlgmr.msra.gmra.mrb[8].mxu1 %vm212_vm1, %v6115_v46 }
  0xb8   : > { %5344 = vmatpush3.bf16.msra.mxu1 %v5826_v3  ;;  %5339 = vmatprep.mubr.msk.bf16.mxu1 %vm212_vm1, %v6120_v50  ;;  %v5763_v3 = vld [vmem:[%s6684_s1 + $0x8] sm:$0x3] }
  0xb9   : > { %5708 = vmatprep.subr.msk.bf16.mxu1 %vm225_vm0, %v5758_v21  ;;  %v4797_v21 = vld [vmem:[%s5823_s21 + $0xd0] sm:$0xf] }
  0xbd   : > { %5260 = vmatmul.mubr.msk.bf16.gmra.mrb[12].mxu0 %vm212_vm1, %v6016_v44  ;;  %v6704_v44 = vld [vmem:[#allocation2_spill] sm:$0xff] }
  0xbe   : > { %5265 = vmatprep.mubr.msk.bf16.mxu0 %vm212_vm1, %v6090_v17  ;;  %v5750_v17 = vld [vmem:[%s5823_s21 + $0xb8] ss:$8 sps:$4 sm:$0xff]  }
  0xbf   : > { %5340 = vmatmul.mubr.msk.bf16.gmra.mrb[12].mxu1 %vm212_vm1, %v6156_v38 }
  0xc0   : > { %5345 = vmatprep.mubr.msk.bf16.mxu1 %vm212_vm1, %v6023_v4  ;;  %v6706_v4 = vld [vmem:[#allocation5_spill] sm:$0xff] }
  0xc5   : > { %5266 = vmatmul.mubr.msk.bf16.vlgmr.msra.gmra.mrb[8].mxu0 %vm212_vm1, %v6115_v46  ;;  %v4783_v46 = vld [vmem:[%s5823_s21 + $0x98] sm:$0xf] }
  0xc6   : > { %5269 = vmatprep.mubr.msk.bf16.mxu0 %vm212_vm1, %v6120_v50  ;;  %5274 = vmatpush3.bf16.msra.mxu0 %v5944_v59  ;;  %v4785_v50 = vld [vmem:[%s5823_s21 + $0xa0] sm:$0xf] }
  0xc7   : > { %5701 = vmatprep.subr.msk.bf16.mxu0 %vm225_vm0, %v5763_v3  ;;  %5346 = vmatmul.mubr.msk.bf16.vlgmr.msra.gmra.mrb[8].mxu1 %vm212_vm1, %v6045_v24  ;;  %v5748_v24 = vld [vmem:[%s5823_s21 + $0x98] ss:$8 sps:$4 sm:$0xff]  }
  0xc8   : > { %5354 = vmatpush3.bf16.msra.mxu1 %v5848_v8  ;;  %5349 = vmatprep.mubr.msk.bf16.mxu1 %vm212_vm1, %v6058_v5  ;;  %v5764_v8 = vld [vmem:[%s6684_s1 + $0xa] sm:$0x3]  ;;  %v5765_v5 = vld [vmem:[%s6684_s1 + $0xc] sm:$0x3] }
  0xc9   : > { %5709 = vmatprep.subr.msk.bf16.mxu1 %vm225_vm0, %v5762_v47  ;;  %v5754_v47 = vld [vmem:[%s5823_s21 + $0x100] ss:$8 sps:$4 sm:$0xff]  }
  0xcd   : > { %5270 = vmatmul.mubr.msk.bf16.gmra.mrb[12].mxu0 %vm212_vm1, %v6156_v38  ;;  %v3338_v38 = vshll.u32 %v4783_v46, 16 }
  0xce   : > { %5275 = vmatprep.mubr.msk.bf16.mxu0 %vm212_vm1, %v6148_v32  ;;  %v3335_v32 = vshrl.u32 %v4783_v46, 16  ;;  %v3400_v46 = vshll.u32 %v4792_v9, 16 }
  0xcf   : > { %5350 = vmatmul.mubr.msk.bf16.gmra.mrb[12].mxu1 %vm212_vm1, %v6088_v16  ;;  %v5749_v16 = vld [vmem:[%s5823_s21 + $0xa8] ss:$8 sps:$4 sm:$0xff]  }
  0xd0   : > { %5355 = vmatprep.mubr.msk.bf16.mxu1 %vm212_vm1, %v6167_v56  ;;  %v6707_v56 = vld [vmem:[#allocation6_spill] sm:$0xff] }
  0xd5   : > { %5276 = vmatmul.mubr.msk.bf16.vlgmr.msra.gmra.mrb[8].mxu0 %vm212_vm1, %v6180_v23  ;;  %v4787_v23 = vld [vmem:[%s5823_s21 + $0xa8] sm:$0xf] }
  0xd6   : > { %5279 = vmatprep.mubr.msk.bf16.mxu0 %vm212_vm1, %v6186_v15  ;;  %5284 = vmatpush3.bf16.msra.mxu0 %v5995_v12  ;;  %v3349_v15 = vshrl.u32 %v4785_v50, 16 }
  0xd7   : > { %5702 = vmatprep.subr.msk.bf16.mxu0 %vm225_vm0, %v5764_v8  ;;  %5356 = vmatmul.mubr.msk.bf16.vlgmr.msra.gmra.mrb[8].mxu1 %vm212_vm1, %v6189_v7  ;;  %v3352_v7 = vshll.u32 %v4785_v50, 16 }
  0xd8   : > { %5364 = vmatpush3.bf16.msra.mxu1 %v5944_v59  ;;  %5359 = vmatprep.mubr.msk.bf16.mxu1 %vm212_vm1, %v6206_v27  ;;  %v6703_v59 = vld [vmem:[#allocation3_spill] sm:$0xff] }
  0xd9   : > { %5710 = vmatprep.subr.msk.bf16.mxu1 %vm225_vm0, %v5763_v3  ;;  %v5751_v27 = vld [vmem:[%s5823_s21 + $0xc8] ss:$8 sps:$4 sm:$0xff]  }
  0xdd   : > { %5280 = vmatmul.mubr.msk.bf16.gmra.mrb[12].mxu0 %vm212_vm1, %v6212_v39  ;;  %v3337_v39 = vrot.slane %v3335_v32, 4  ;;  %v3421_v32 = vrot.slane %v3419_v1, 4 }
  0xde   : > { %5285 = vmatprep.mubr.msk.bf16.mxu0 %vm212_vm1, %v6237_v61 }
  0xdf   : > { %5360 = vmatmul.mubr.msk.bf16.gmra.mrb[12].mxu1 %vm212_vm1, %v6234_v60  ;;  %v3340_v60 = vrot.slane %v3338_v38, 5  ;;  %v3424_v38 = vrot.slane %v3422_v58, 5  ;;  %v4167_v58 = vshll.u32 %v4843_v0, 16 }
  0xe0   : > { %5365 = vmatprep.mubr.msk.bf16.mxu1 %vm212_vm1, %v6237_v61  ;;  %v4789_v61 = vld [vmem:[%s5823_s21 + $0xb0] sm:$0xf] }
  0xe1   : > { %v3377_v2 = vshrl.u32 %v4789_v61, 16  ;;  %v3380_v35 = vshll.u32 %v4789_v61, 16  ;;  %v3341_v49 = vor.u32 %v3340_v60, %v3337_v39  ;;  %v4796_v61 = vld [vmem:[%s5823_s21 + $0xcc] sm:$0x1] }
  0xe3   : > { %v3379_v13 = vrot.slane %v3377_v2, 4 }
  0xe5   : > { %5286 = vmatmul.mubr.msk.bf16.vlgmr.msra.gmra.mrb[8].mxu0 %vm212_vm1, %v6261_v43 }
  0xe6   : > { %5289 = vmatprep.mubr.msk.bf16.mxu0 %vm212_vm1, %v6269_v51  ;;  %5294 = vmatpush3.bf16.msra.mxu0 %v6703_v59 }
  0xe7   : > { %5703 = vmatprep.subr.msk.bf16.mxu0 %vm225_vm0, %v6704_v44  ;;  %5366 = vmatmul.mubr.msk.bf16.vlgmr.msra.gmra.mrb[8].mxu1 %vm212_vm1, %v6261_v43  ;;  %v3363_v43 = vshrl.u32 %v4787_v23, 16 }
  0xe8   : > { %5374 = vmatpush3.bf16.msra.mxu1 %v5995_v12  ;;  %5369 = vmatprep.mubr.msk.bf16.mxu1 %vm212_vm1, %v6269_v51  ;;  %v6705_v12 = vld [vmem:[#allocation4_spill] sm:$0xff]  ;;  %v3366_v51 = vshll.u32 %v4787_v23, 16  ;;  %v4839_v23 = vld [vmem:[%s5823_s21 + $0xe0] sm:$0xf] }
  0xe9   : > { %5711 = vmatprep.subr.msk.bf16.mxu1 %vm225_vm0, %v5764_v8  ;;  %v3365_v34 = vrot.slane %v3363_v43, 4 }
  0xea   : > { %v3368_v37 = vrot.slane %v3366_v51, 5 }
  0xec   : > { %v3369_v25 = vor.u32 %v3368_v37, %v3365_v34  ;;  %v3428_v34 = vshll.u32 %v4796_v61, 16 }
  0xed   : > { %5290 = vmatmul.mubr.msk.bf16.gmra.mrb[12].mxu0 %vm212_vm1, %v6298_v40 }
  0xee   : > { %5295 = vmatprep.mubr.msk.bf16.mxu0 %vm212_vm1, %v6308_v33 }
  0xef   : > { %5370 = vmatmul.mubr.msk.bf16.gmra.mrb[12].mxu1 %vm212_vm1, %v6298_v40  ;;  %v4784_v40 = vld [vmem:[%s5823_s21 + $0x9c] sm:$0x1] }
  0xf0   : > { %5375 = vmatprep.mubr.msk.bf16.mxu1 %vm212_vm1, %v6308_v33  ;;  %v5752_v33 = vld [vmem:[%s5823_s21 + $0xe0] ss:$8 sps:$4 sm:$0xff]   ;;  %v3344_v18 = vshll.u32 %v4784_v40, 16  ;;  %v4798_v40 = vld [vmem:[%s5823_s21 + $0xd4] sm:$0x1] }
  0xf2   : > { %v3346_v11 = vrot.slane %v3344_v18, 5  ;;  %v3425_v18 = vor.u32 %v3424_v38, %v3421_v32 }
  0xf5   : > { %5296 = vmatmul.mubr.msk.bf16.vlgmr.msra.gmra.mrb[8].mxu0 %vm212_vm1, %v6331_v48 }
  0xf6   : > { %5299 = vmatprep.mubr.msk.bf16.mxu0 %vm212_vm1, %v6333_v6  ;;  %5304 = vmatpush3.bf16.msra.mxu0 %v6705_v12 }
  0xf7   : > { %5704 = vmatprep.subr.msk.bf16.mxu0 %vm225_vm0, %v6706_v4  ;;  %5376 = vmatmul.mubr.msk.bf16.vlgmr.msra.gmra.mrb[8].mxu1 %vm212_vm1, %v6331_v48  ;;  %v3351_v48 = vrot.slane %v3349_v15, 4  ;;  %v4841_v15 = vld [vmem:[%s5823_s21 + $0xe8] sm:$0xf] }
  0xf8   : > { %5384 = vmatpush3.bf16.msra.mxu1 %v6703_v59  ;;  %5379 = vmatprep.mubr.msk.bf16.mxu1 %vm212_vm1, %v6333_v6  ;;  %v3354_v6 = vrot.slane %v3352_v7, 5  ;;  %v3407_v59 = vrot.slane %v3405_v41, 4  ;;  %v4153_v2 = vshll.u32 %v4841_v15, 16 }
  0xf9   : > { %5712 = vmatprep.subr.msk.bf16.mxu1 %vm225_vm0, %v5765_v5  ;;  %v3436_v5 = vshll.u32 %v4797_v21, 16 }
  0xfa   : > { %v3355_v54 = vor.u32 %v3354_v6, %v3351_v48  ;;  %v4136_v6 = vshrl.u32 %v4839_v23, 16 }
  0xfb   : > { %v3438_v48 = vrot.slane %v3436_v5, 5 }
  0xfc   : > { %v3356_v3 = vrot.slane %v3355_v54, 4 }
  0xfd   : > { %5300 = vmatmul.mubr.msk.bf16.gmra.mrb[12].mxu0 %vm212_vm1, %v6355_v52 }
  0xfe   : > { %5305 = vmatprep.mubr.msk.bf16.mxu0 %vm212_vm1, %v5748_v24  ;;  %v3433_v24 = vshrl.u32 %v4797_v21, 16 }
  0xff   : > { %5380 = vmatmul.mubr.msk.bf16.gmra.mrb[12].mxu1 %vm212_vm1, %v6355_v52  ;;  %v4791_v52 = vld [vmem:[%s5823_s21 + $0xb8] sm:$0xf] }
 0x100   : > { %5385 = vmatprep.mubr.msk.bf16.mxu1 %vm212_vm1, %v6372_v10  ;;  %v4786_v10 = vld [vmem:[%s5823_s21 + $0xa4] sm:$0x1]  ;;  %v3391_v53 = vshrl.u32 %v4791_v52, 16  ;;  %v3394_v19 = vshll.u32 %v4791_v52, 16  ;;  %v4139_v52 = vshll.u32 %v4839_v23, 16 }
 0x101   : > { %v3358_v55 = vshll.u32 %v4786_v10, 16  ;;  %v4150_v10 = vshrl.u32 %v4841_v15, 16  ;;  %v4844_v23 = vld [vmem:[%s5823_s21 + $0xf4] sm:$0x1] }
 0x102   : > { %v3393_v26 = vrot.slane %v3391_v53, 4  ;;  %v3396_v31 = vrot.slane %v3394_v19, 5  ;;  %v3442_v53 = vshll.u32 %v4798_v40, 16  ;;  %v4840_v19 = vld [vmem:[%s5823_s21 + $0xe4] sm:$0x1] }
 0x103   : > { %v3360_v8 = vrot.slane %v3358_v55, 5 }
 0x104   : > { %v3397_v50 = vor.u32 %v3396_v31, %v3393_v26  ;;  %v3444_v9 = vrot.slane %v3442_v53, 5  ;;  %v4164_v31 = vshrl.u32 %v4843_v0, 16 }
 0x105   : > { %5306 = vmatmul.mubr.msk.bf16.vlgmr.msra.gmra.mrb[8].mxu0 %vm212_vm1, %v5749_v16  ;;  %v6576_v16 = vrot.slane %v3369_v25, 4  ;;  %v4145_v25 = vshll.u32 %v4840_v19, 16 }
 0x106   : > { %5309 = vmatprep.mubr.msk.bf16.mxu0 %vm212_vm1, %v5750_v17  ;;  %5314 = vmatpush3.bf16.msra.mxu0 %v6707_v56  ;;  %v6578_v17 = vrot.slane %v3372_v14, 5  ;;  %v3398_v29 = vrot.slane %v3397_v50, 4  ;;  %v4845_v14 = vld [vmem:[%s5823_s21 + $0xf8] sm:$0xf]  ;;  %v4166_v15 = vrot.slane %v4164_v31, 4 }
 0x107   : > { %5705 = vmatprep.subr.msk.bf16.mxu0 %vm225_vm0, %v6202_v30  ;;  %5386 = vmatmul.mubr.msk.bf16.vlgmr.msra.gmra.mrb[8].mxu1 %vm212_vm1, %v6390_v28  ;;  %v3382_v28 = vrot.slane %v3380_v35, 5  ;;  %v5755_v35 = vld [vmem:[%s5823_s21 + $0x110] ss:$8 sps:$4 sm:$0xff]   ;;  %v4147_v5 = vrot.slane %v4145_v25, 5 }
 0x108   : > { %5394 = vmatpush3.bf16.msra.mxu1 %v6705_v12  ;;  %5389 = vmatprep.mubr.msk.bf16.mxu1 %vm212_vm1, %v6394_v63  ;;  %v3342_v63 = vrot.slane %v3341_v49, 4  ;;  %v3386_v12 = vshll.u32 %v4790_v22, 16  ;;  %v3402_v49 = vrot.slane %v3400_v46, 5  ;;  %v4141_v22 = vrot.slane %v4139_v52, 5  ;;  %v4853_v52 = vld [vmem:[%s5823_s21 + $0x118] sm:$0xf] }
 0x109   : > { %5713 = vmatprep.subr.msk.bf16.mxu1 %vm225_vm0, %v6706_v4  ;;  %v3383_v44 = vor.u32 %v3382_v28, %v3379_v13  ;;  %v4794_v4 = vld [vmem:[%s5823_s21 + $0xc4] sm:$0x1]  ;;  %v4152_v13 = vrot.slane %v4150_v10, 4  ;;  %v4155_v28 = vrot.slane %v4153_v2, 5  ;;  %v4173_v2 = vshll.u32 %v4844_v23, 16 }
 0x10a   : > { %v3347_v7 = vsel %vm5868_vm4, %v3342_v63, %v3346_v11  ;;  %v3414_v60 = vshll.u32 %v4794_v4, 16  ;;  %v3388_v51 = vrot.slane %v3386_v12, 5  ;;  %v3426_v63 = vrot.slane %v3425_v18, 4 }
 0x10b   : > { %v3384_v43 = vrot.slane %v3383_v44, 4  ;;  %v3430_v11 = vrot.slane %v3428_v34, 5  ;;  %v4181_v44 = vshll.u32 %v4845_v14, 16 }
 0x10c   : > { %v3416_v45 = vrot.slane %v3414_v60, 5  ;;  %v4846_v60 = vld [vmem:[%s5823_s21 + $0xfc] sm:$0x1] }
 0x10d   : > { %5310 = vmatmul.mubr.msk.bf16.gmra.mrb[12].mxu0 %vm212_vm1, %v5751_v27  ;;  %v3361_v27 = vsel %vm5868_vm4, %v3356_v3, %v3360_v8  ;;  %v3389_v55 = vsel %vm5868_vm4, %v3384_v43, %v3388_v51  ;;  %v4849_v3 = vld [vmem:[%s5823_s21 + $0x108] sm:$0xf]  ;;  %v4183_v43 = vrot.slane %v4181_v44, 5  ;;  %v4851_v51 = vld [vmem:[%s5823_s21 + $0x110] sm:$0xf] }
 0x10e   : > { %5315 = vmatprep.mubr.msk.bf16.mxu0 %vm212_vm1, %v5752_v33  ;;  %v4799_v54 = vcombine.low %v3347_v7, %v3361_v27  ;;  %v4206_v46 = vshrl.u32 %v4849_v3, 16  ;;  %v4209_v50 = vshll.u32 %v4849_v3, 16  ;;  %v4169_v7 = vrot.slane %v4167_v58, 5 }
 0x10f   : > { %5390 = vmatmul.mubr.msk.bf16.gmra.mrb[12].mxu1 %vm212_vm1, %v6414_v62  ;;  %v3410_v62 = vrot.slane %v3408_v42, 5  ;;  %v4842_v42 = vld [vmem:[%s5823_s21 + $0xec] sm:$0x1]  ;;  %v4220_v53 = vshrl.u32 %v4851_v51, 16  ;;  %v4223_v19 = vshll.u32 %v4851_v51, 16 }
 0x110   : > { %5395 = vmatprep.mubr.msk.bf16.mxu1 %vm212_vm1, %v5752_v33  ;;  %v3435_v33 = vrot.slane %v3433_v24, 4  ;;  %v4159_v26 = vshll.u32 %v4842_v42, 16  ;;  %v3431_v24 = vsel %vm5868_vm4, %v3426_v63, %v3430_v11 }
 0x111   : > { %v3411_v39 = vor.u32 %v3410_v62, %v3407_v59  ;;  %v4156_v59 = vor.u32 %v4155_v28, %v4152_v13  ;;  %v4178_v62 = vshrl.u32 %v4845_v14, 16  ;;  %v4222_v63 = vrot.slane %v4220_v53, 4 }
 0x112   : > { %v3439_v41 = vor.u32 %v3438_v48, %v3435_v33  ;;  %v4161_v38 = vrot.slane %v4159_v26, 5  ;;  %v4208_v48 = vrot.slane %v4206_v46, 4  ;;  %v4225_v11 = vrot.slane %v4223_v19, 5 }
 0x113   : > { %v3412_v37 = vrot.slane %v3411_v39, 4  ;;  %v4157_v39 = vrot.slane %v4156_v59, 4  ;;  %v4180_v61 = vrot.slane %v4178_v62, 4 }
 0x114   : > { %v3440_v1 = vrot.slane %v3439_v41, 4 }
 0x115   : > { %5316 = vmatmul.mubr.msk.bf16.vlgmr.msra.gmra.mrb[8].mxu0 %vm212_vm1, %v5753_v57  ;;  %v3417_v21 = vsel %vm5868_vm4, %v3412_v37, %v3416_v45  ;;  %v4162_v34 = vsel %vm5868_vm4, %v4157_v39, %v4161_v38  ;;  %v4170_v37 = vor.u32 %v4169_v7, %v4166_v15  ;;  %v4184_v45 = vor.u32 %v4183_v43, %v4180_v61 }
 0x116   : > { %5319 = vmatprep.mubr.msk.bf16.mxu0 %vm212_vm1, %v5754_v47  ;;  %5324 = vmatpush3.bf16.msra.mxu0 %v6246_v20  ;;  %v3445_v32 = vsel %vm5868_vm4, %v3440_v1, %v3444_v9  ;;  %v4854_v1 = vld [vmem:[%s5823_s21 + $0x11c] sm:$0x1] }
 0x117   : > { %5396 = vmatmul.mubr.msk.bf16.vlgmr.msra.gmra.mrb[8].mxu1 %vm212_vm1, %v5753_v57  ;;  %v3403_v57 = vsel %vm5868_vm4, %v3398_v29, %v3402_v49  ;;  %v4802_v10 = vcombine.low %v3431_v24, %v3445_v32  ;;  %v4848_v29 = vld [vmem:[%s5823_s21 + $0x104] sm:$0x1]  ;;  %v4850_v49 = vld [vmem:[%s5823_s21 + $0x10c] sm:$0x1]  ;;  %v4171_v13 = vrot.slane %v4170_v37, 4  ;;  %v4185_v28 = vrot.slane %v4184_v45, 4 }
 0x118   : > { %5404 = vmatpush3.bf16.msra.mxu1 %v6707_v56  ;;  %5399 = vmatprep.mubr.msk.bf16.mxu1 %vm212_vm1, %v5754_v47  ;;  %v3375_v56 = vsel %vm5868_vm4, %v6576_v16, %v6578_v17  ;;  %v4847_v47 = vld [vmem:[%s5823_s21 + $0x100] sm:$0xf]  ;;  %v4801_v4 = vcombine.low %v3403_v57, %v3417_v21  ;;  %v4201_v41 = vshll.u32 %v4848_v29, 16  ;;  %v4215_v0 = vshll.u32 %v4850_v49, 16 }
 0x119   : > { %5714 = vmatprep.subr.msk.bf16.mxu1 %vm225_vm0, %v6202_v30  ;;  %v4138_v30 = vrot.slane %v4136_v6, 4  ;;  %v4800_v12 = vcombine.low %v3375_v56, %v3389_v55  ;;  %v4192_v16 = vshrl.u32 %v4847_v47, 16  ;;  %v4195_v17 = vshll.u32 %v4847_v47, 16 }
 0x11a   : > { %v4211_v6 = vrot.slane %v4209_v50, 5  ;;  %v4237_v56 = vshll.u32 %v4853_v52, 16  ;;  %v4203_v9 = vrot.slane %v4201_v41, 5  ;;  %v4217_v31 = vrot.slane %v4215_v0, 5 }
 0x11b   : > { %v4142_v8 = vor.u32 %v4141_v22, %v4138_v30  ;;  %v4194_v40 = vrot.slane %v4192_v16, 4  ;;  %v4197_v33 = vrot.slane %v4195_v17, 5  ;;  %v4175_v30 = vrot.slane %v4173_v2, 5 }
 0x11c   : > { %v4212_v42 = vor.u32 %v4211_v6, %v4208_v48  ;;  %v4239_v14 = vrot.slane %v4237_v56, 5  ;;  %v4243_v62 = vshll.u32 %v4854_v1, 16 }
 0x11d   : > { %5320 = vmatmul.mubr.msk.bf16.gmra.mrb[12].mxu0 %vm212_vm1, %v5755_v35  ;;  %v4143_v27 = vrot.slane %v4142_v8, 4  ;;  %v4198_v55 = vor.u32 %v4197_v33, %v4194_v40  ;;  %v4176_v58 = vsel %vm5868_vm4, %v4171_v13, %v4175_v30  ;;  %v4226_v8 = vor.u32 %v4225_v11, %v4222_v63 }
 0x11e   : > { %5325 = vmatprep.mubr.msk.bf16.mxu0 %vm212_vm1, %v4799_v54  ;;  %v4213_v26 = vrot.slane %v4212_v42, 4  ;;  %v4245_v46 = vrot.slane %v4243_v62, 5 }
 0x11f   : > { %5400 = vmatmul.mubr.msk.bf16.gmra.mrb[12].mxu1 %vm212_vm1, %v5755_v35  ;;  %v4187_v35 = vshll.u32 %v4846_v60, 16  ;;  %v4148_v18 = vsel %vm5868_vm4, %v4143_v27, %v4147_v5  ;;  %v4199_v21 = vrot.slane %v4198_v55, 4  ;;  %v4227_v16 = vrot.slane %v4226_v8, 4 }
 0x120   : > { %5405 = vmatprep.mubr.msk.bf16.mxu1 %vm212_vm1, %v4799_v54  ;;  %v4234_v54 = vshrl.u32 %v4853_v52, 16  ;;  %v4855_v22 = vcombine.low %v4148_v18, %v4162_v34 }
 0x121   : > { %v4189_v57 = vrot.slane %v4187_v35, 5  ;;  %v4204_v44 = vsel %vm5868_vm4, %v4199_v21, %v4203_v9 }
 0x122   : > { %v4236_v25 = vrot.slane %v4234_v54, 4 }
 0x123   : > { %v4190_v3 = vsel %vm5868_vm4, %v4185_v28, %v4189_v57 }
 0x124   : > { %v4240_v59 = vor.u32 %v4239_v14, %v4236_v25  ;;  %v4863_v14 = vld [vmem:[%s6685_s2] ss:$0 sm:$0xff] }
 0x125   : > { %5326 = vmatmul.mubr.msk.bf16.vlgmr.msra.gmra.mrb[8].mxu0 %vm212_vm1, %v4800_v12 }
 0x126   : > { %5329 = vmatprep.mubr.msk.bf16.mxu0 %vm212_vm1, %v4801_v4  ;;  %v4241_v17 = vrot.slane %v4240_v59, 4 }
 0x127   : > { %5406 = vmatmul.mubr.msk.bf16.vlgmr.msra.gmra.mrb[8].mxu1 %vm212_vm1, %v4800_v12  ;;  %v4218_v12 = vsel %vm5868_vm4, %v4213_v26, %v4217_v31 }
 0x128   : > { %5414 = vmatpush3.bf16.msra.mxu1 %v6246_v20  ;;  %5409 = vmatprep.mubr.msk.bf16.mxu1 %vm212_vm1, %v4801_v4  ;;  %v4852_v20 = vld [vmem:[%s5823_s21 + $0x114] sm:$0x1]  ;;  %v4856_v4 = vcombine.low %v4176_v58, %v4190_v3  ;;  %v4857_v5 = vcombine.low %v4204_v44, %v4218_v12  ;;  %v4246_v32 = vsel %vm5868_vm4, %v4241_v17, %v4245_v46 }
 0x129   : > { %v4229_v47 = vshll.u32 %v4852_v20, 16 }
 0x12b   : > { %v4231_v24 = vrot.slane %v4229_v47, 5 }
 0x12d   : > { %5330 = vmatmul.mubr.msk.bf16.gmra.mrb[12].mxu0 %vm212_vm1, %v4802_v10  ;;  %v4232_v50 = vsel %vm5868_vm4, %v4227_v16, %v4231_v24 }
 0x12e   : > { %v4858_v38 = vcombine.low %v4232_v50, %v4246_v32 }
 0x12f   : > { %5410 = vmatmul.mubr.msk.bf16.gmra.mrb[12].mxu1 %vm212_vm1, %v4802_v10 }
 0x130   : > { %5415 = vmatprep.mubr.msk.bf16.mxu1 %vm212_vm1, %v4855_v22 }
 0x137   : > { %5416 = vmatmul.mubr.msk.bf16.vlgmr.msra.gmra.mrb[8].mxu1 %vm212_vm1, %v4856_v4 }
 0x138   : > { %5419 = vmatprep.mubr.msk.bf16.mxu1 %vm212_vm1, %v4857_v5 }
 0x13f   : > { %5420 = vmatmul.mubr.msk.bf16.gmra.mrb[12].mxu1 %vm212_vm1, %v4858_v38 }
 0x168   : > { %v5147_v23 = vpop.f32.mrb[0].mxu0 }
 0x169   : > { %v1524_v15 = vpop.f32.mrb[1].mxu0 }
 0x16a   : > { %v5148_v7 = vpop.f32.mrb[2].mxu0 }
 0x16b   : > { %v1527_v27 = vpop.f32.mrb[3].mxu0 }
 0x170   : > { %v5151_v39 = vpop.f32.mrb[4].mxu0 }
 0x171   : > { %v1540_v60 = vpop.f32.mrb[5].mxu0 }
 0x172   : > { %v5152_v61 = vpop.f32.mrb[6].mxu0 }
 0x173   : > { %v1543_v43 = vpop.f32.mrb[7].mxu0 }
 0x17a   : > { %v5237_v51 = vpop.f32.mrb[0].mxu1 }
 0x17b   : > { %v2662_v40 = vmax.f32 %v5147_v23, %v5237_v51  ;;  %v2621_v33 = vpop.f32.mrb[1].mxu1 }
 0x17c   : > { %v2660_v48 = vmax.f32 %v1524_v15, %v2621_v33  ;;  %v5238_v6 = vpop.f32.mrb[2].mxu1 }
 0x17d   : > { %v2663_v52 = vmax.f32 %v5148_v7, %v5238_v6  ;;  %v2624_v10 = vpop.f32.mrb[3].mxu1 }
 0x17e   : > { %v2661_v36 = vmax.f32 %v1527_v27, %v2624_v10 }
 0x182   : > { %v5241_v2 = vpop.f32.mrb[4].mxu1 }
 0x183   : > { %v2666_v35 = vmax.f32 %v5151_v39, %v5241_v2  ;;  %v2637_v29 = vpop.f32.mrb[5].mxu1 }
 0x184   : > { %v2664_v49 = vmax.f32 %v1540_v60, %v2637_v29  ;;  %v5242_v18 = vpop.f32.mrb[6].mxu1 }
 0x185   : > { %v2667_v34 = vmax.f32 %v5152_v61, %v5242_v18  ;;  %v2640_v37 = vpop.f32.mrb[7].mxu1 }
 0x186   : > { %v2665_v45 = vmax.f32 %v1543_v43, %v2640_v37 }
 0x1f8   : > { %v5327_v53 = vpop.f32.mrb[8].mxu0 }
 0x1f9   : > { %v3545_v19 = vmax.f32 %v2662_v40, %v5327_v53  ;;  %v3504_v54 = vpop.f32.mrb[9].mxu0 }
 0x1fa   : > { %v3543_v56 = vmax.f32 %v2660_v48, %v3504_v54  ;;  %v5328_v55 = vpop.f32.mrb[10].mxu0 }
 0x1fb   : > { %v3546_v41 = vmax.f32 %v2663_v52, %v5328_v55  ;;  %v3507_v42 = vpop.f32.mrb[11].mxu0 }
 0x1fc   : > { %v3544_v0 = vmax.f32 %v2661_v36, %v3507_v42 }
 0x200   : > { %v5331_v30 = vpop.f32.mrb[12].mxu0 }
 0x201   : > { %v3549_v22 = vmax.f32 %v2666_v35, %v5331_v30  ;;  %v3520_v13 = vpop.f32.mrb[13].mxu0 }
 0x202   : > { %v3547_v28 = vmax.f32 %v2664_v49, %v3520_v13  ;;  %v5332_v57 = vpop.f32.mrb[14].mxu0 }
 0x203   : > { %v3550_v20 = vmax.f32 %v2667_v34, %v5332_v57  ;;  %v3523_v63 = vpop.f32.mrb[15].mxu0 }
 0x204   : > { %v3548_v11 = vmax.f32 %v2665_v45, %v3523_v63 }
 0x20a   : > { %v5417_v25 = vpop.f32.mrb[8].mxu1 }
 0x20b   : > { %v4346_v21 = vmax.f32 %v3545_v19, %v5417_v25  ;;  %v4305_v9 = vpop.f32.mrb[9].mxu1 }
 0x20c   : > { %v4344_v26 = vmax.f32 %v3543_v56, %v4305_v9  ;;  %v5418_v31 = vpop.f32.mrb[10].mxu1 }
 0x20d   : > { %v4361_v1 = vadd.f32 %v4863_v14, %v4346_v21  ;;  %v4347_v58 = vmax.f32 %v3546_v41, %v5418_v31  ;;  %v4308_v47 = vpop.f32.mrb[11].mxu1 }
 0x20e   : > { %v4359_v3 = vadd.f32 %v4863_v14, %v4344_v26  ;;  %v4345_v8 = vmax.f32 %v3544_v0, %v4308_v47 }
 0x20f   : > { %v4369_v59 = vmax.f32 %v4361_v1, 0.0  ;;  %v4362_v62 = vadd.f32 %v4863_v14, %v4347_v58 }
 0x210   : > { %v4367_v44 = vmax.f32 %v4359_v3, 0.0  ;;  %v4360_v12 = vadd.f32 %v4863_v14, %v4345_v8 }
 0x211   : > { %v4877_v4 = vpack.c.bf16 %v4369_v59, %v4369_v59  ;;  %v4370_v24 = vmax.f32 %v4362_v62, 0.0 }
 0x212   : > { %v4875_v5 = vpack.c.bf16 %v4367_v44, %v4367_v44  ;;  %v4368_v16 = vmax.f32 %v4360_v12, 0.0  ;;  %v5421_v17 = vpop.f32.mrb[12].mxu1 }
 0x213   : > { %4410 = vst.msk [vmem:[%s6662_s30 + $0x8] sm:$0xf] %vm4407_vm5, %v4877_v4  ;;  %v4878_v46 = vpack.c.bf16 %v4370_v24, %v4370_v24  ;;  %v4350_v50 = vmax.f32 %v3549_v22, %v5421_v17  ;;  %v4321_v32 = vpop.f32.mrb[13].mxu1 }
 0x214   : > { %4408 = vst.msk [vmem:[%s6662_s30] sm:$0xf] %vm4407_vm5, %v4875_v5  ;;  %v4876_v38 = vpack.c.bf16 %v4368_v16, %v4368_v16  ;;  %v4348_v23 = vmax.f32 %v3547_v28, %v4321_v32  ;;  %v5422_v15 = vpop.f32.mrb[14].mxu1 }
 0x215   : > { %4411 = vst.msk [vmem:[%s6662_s30 + $0xc] sm:$0xf] %vm4407_vm5, %v4878_v46  ;;  %v4365_v7 = vadd.f32 %v4863_v14, %v4350_v50  ;;  %v4351_v27 = vmax.f32 %v3550_v20, %v5422_v15  ;;  %v4324_v39 = vpop.f32.mrb[15].mxu1 }
 0x216   : > { %4409 = vst.msk [vmem:[%s6662_s30 + $0x4] sm:$0xf] %vm4407_vm5, %v4876_v38  ;;  %v4363_v60 = vadd.f32 %v4863_v14, %v4348_v23  ;;  %v4349_v61 = vmax.f32 %v3548_v11, %v4324_v39 }
 0x217   : > { %v4373_v43 = vmax.f32 %v4365_v7, 0.0  ;;  %v4366_v51 = vadd.f32 %v4863_v14, %v4351_v27 }
 0x218   : > { %v4371_v40 = vmax.f32 %v4363_v60, 0.0  ;;  %v4364_v33 = vadd.f32 %v4863_v14, %v4349_v61 }
 0x219   : > { %v4881_v48 = vpack.c.bf16 %v4373_v43, %v4373_v43  ;;  %v4374_v6 = vmax.f32 %v4366_v51, 0.0 }
 0x21a   : > { %v4879_v52 = vpack.c.bf16 %v4371_v40, %v4371_v40  ;;  %v4372_v10 = vmax.f32 %v4364_v33, 0.0 }
 0x21b   : > { %4414 = vst.msk [vmem:[%s6662_s30 + $0x18] sm:$0xf] %vm4407_vm5, %v4881_v48  ;;  %v4882_v36 = vpack.c.bf16 %v4374_v6, %v4374_v6 }
 0x21c   : > { %4412 = vst.msk [vmem:[%s6662_s30 + $0x10] sm:$0xf] %vm4407_vm5, %v4879_v52  ;;  %v4880_v2 = vpack.c.bf16 %v4372_v10, %v4372_v10 }
 0x21d   : > { %4415 = vst.msk [vmem:[%s6662_s30 + $0x1c] sm:$0xf] %vm4407_vm5, %v4882_v36 }
 0x21e   : > { %4413 = vst.msk [vmem:[%s6662_s30 + $0x14] sm:$0xf] %vm4407_vm5, %v4880_v2 }
 0x21f PF: > { %s13_s12 = sadd.s32 1, %s5772_s12  }
 0x220   : > { %p10_p4 = scmp.ge.s32.totalorder %s13_s12, 4  }
 0x222   :  { %12 = sbr.rel (!%p10_p4) target bundleno = 1 (0x1), region = 77 }

</bundles_post_ra>
